<compile_context>
chip_gen: v7x
topology: tpu7x:2x2x1
jax: 0.10.0
libtpu: 0.0.40
codegen_flags: <defaults>
</compile_context>

<pallas_src>
import jax
import jax.numpy as jnp
from jax.experimental import pallas as pl
from jax.experimental.pallas import tpu as pltpu

IN_DIM = 28 * 28   # 784
HIDDEN_1 = 512
HIDDEN_2 = 512
OUT_DIM = 10
OUT_PAD = 128      # lane-dense padded logits width (sliced back to 10)
TB_MAX = 1024      # max batch-tile rows (amortizes ~0.35us/step overhead)


def _cdiv(a, b):
    return -(-a // b)


def _round_up(x, m):
    return ((x + m - 1) // m) * m


def _choose_tiling(batch):
    """Balanced batch tiles; >=2 tiles when worthwhile (v7x megacore split)."""
    nt = _cdiv(batch, TB_MAX)
    if nt < 2 and batch > 16:
        nt = 2                      # give both v7x TensorCores a tile
    tb = _round_up(_cdiv(batch, nt), 16)   # 16-row groups (bf16 sublane packing)
    return tb, nt * tb, nt


def _mlp_kernel(x_ref, w1_ref, b1_ref, w2_ref, b2_ref, w3_ref, b3_ref, o_ref):
    # In-kernel f32 -> bf16 cast of the activations (hidden under MXU work).
    x = x_ref[...].astype(jnp.bfloat16)

    # fc1 + ReLU: bf16 MXU matmul with f32 accumulation; bias/ReLU in f32.
    h1 = jnp.dot(x, w1_ref[...], preferred_element_type=jnp.float32)
    h1 = jnp.maximum(h1 + b1_ref[...], 0.0)
    # dropout -> identity (eval mode)

    # fc2 + ReLU
    h2 = jnp.dot(h1.astype(jnp.bfloat16), w2_ref[...],
                 preferred_element_type=jnp.float32)
    h2 = jnp.maximum(h2 + b2_ref[...], 0.0)
    # dropout -> identity (eval mode)

    # fc3 (logits, lane-padded to 128; no activation)
    out = jnp.dot(h2.astype(jnp.bfloat16), w3_ref[...],
                  preferred_element_type=jnp.float32) + b3_ref[...]
    o_ref[...] = out.astype(o_ref.dtype)


def prepare_params(params):
    """One-time conversion of f32 params into kernel-ready form.

    Do this ONCE (e.g. at model load), not per forward call: bf16 weight
    casts + fc3 lane-padding to 128 output lanes.
    """
    w1, b1, w2, b2, w3, b3 = params
    w1_b = w1.astype(jnp.bfloat16)
    w2_b = w2.astype(jnp.bfloat16)
    w3_b = jnp.pad(w3, ((0, 0), (0, OUT_PAD - OUT_DIM))).astype(jnp.bfloat16)
    b3_p = jnp.pad(b3, ((0, 0), (0, OUT_PAD - OUT_DIM)))   # stays f32
    return (w1_b, b1, w2_b, b2, w3_b, b3_p)


def net_forward(x, kernel_params):
    """x: (B, 1, 28, 28) or (B, 784) float32. kernel_params: prepare_params(...).

    Returns (B, 10) float32 logits.
    """
    w1_b, b1, w2_b, b2, w3_b, b3_p = kernel_params

    x2d = x.reshape(-1, IN_DIM)          # glue: x.view(-1, 28*28)  (free view)
    batch = x2d.shape[0]

    tb, b_pad, num_tiles = _choose_tiling(batch)
    if b_pad != batch:
        x2d = jnp.pad(x2d, ((0, b_pad - batch), (0, 0)))

    # Weights/biases: constant index_map => DMA'd once, VMEM-resident across
    # batch tiles; single pipeline buffer (no point double-buffering a block
    # that never changes).
    def resident(shape):
        return pl.BlockSpec(shape, lambda i: (0, 0),
                            pipeline_mode=pl.Buffered(1))

    out_padded = pl.pallas_call(
        _mlp_kernel,
        out_shape=jax.ShapeDtypeStruct((b_pad, OUT_PAD), jnp.float32),
        grid=(num_tiles,),
        in_specs=[
            pl.BlockSpec((tb, IN_DIM), lambda i: (i, 0)),   # activations: tiled, f32
            resident((IN_DIM, HIDDEN_1)),                   # bf16 weights
            resident((1, HIDDEN_1)),                        # f32 bias
            resident((HIDDEN_1, HIDDEN_2)),
            resident((1, HIDDEN_2)),
            resident((HIDDEN_2, OUT_PAD)),
            resident((1, OUT_PAD)),
        ],
        out_specs=pl.BlockSpec((tb, OUT_PAD), lambda i: (i, 0)),
        compiler_params=pltpu.CompilerParams(
            dimension_semantics=("parallel",),   # batch tiles -> megacore split
            vmem_limit_bytes=32 << 20,
        ),
    )(x2d, w1_b, b1, w2_b, b2, w3_b, b3_p)

    return out_padded[:batch, :OUT_DIM]


def init_params(key):
    """Deterministic init mimicking nn.Linear's U(-1/sqrt(fan_in), 1/sqrt(fan_in))."""
    ks = jax.random.split(key, 6)

    def linear(kw, kb, fan_in, fan_out):
        bound = 1.0 / jnp.sqrt(jnp.float32(fan_in))
        w = jax.random.uniform(kw, (fan_in, fan_out), jnp.float32, -bound, bound)
        b = jax.random.uniform(kb, (1, fan_out), jnp.float32, -bound, bound)
        return w, b

    w1, b1 = linear(ks[0], ks[1], IN_DIM, HIDDEN_1)
    w2, b2 = linear(ks[2], ks[3], HIDDEN_1, HIDDEN_2)
    w3, b3 = linear(ks[4], ks[5], HIDDEN_2, OUT_DIM)
    return (w1, b1, w2, b2, w3, b3)


if __name__ == "__main__":
    key = jax.random.PRNGKey(0)
    k_params, k_x = jax.random.split(key)
    params = init_params(k_params)
    kparams = prepare_params(params)       # one-time weight prep (not per call)

    # MNIST-like input: (batch=8, 1, 28, 28)
    x = jax.random.normal(k_x, (8, 1, 28, 28), dtype=jnp.float32)

    logits = net_forward(x, kparams)
    jax.block_until_ready(logits)

    # Sanity check vs. a bf16-consistent pure-JAX reference (eval mode =>
    # dropout is identity). Inputs/weights quantized to bf16, f32 accumulation,
    # matching the kernel's numerics.
    w1, b1, w2, b2, w3, b3 = params
    x2d = x.reshape(-1, IN_DIM).astype(jnp.bfloat16)
    ref = jnp.dot(x2d, w1.astype(jnp.bfloat16),
                  preferred_element_type=jnp.float32) + b1
    ref = jnp.maximum(ref, 0.0)
    ref = jnp.dot(ref.astype(jnp.bfloat16), w2.astype(jnp.bfloat16),
                  preferred_element_type=jnp.float32) + b2
    ref = jnp.maximum(ref, 0.0)
    ref = jnp.dot(ref.astype(jnp.bfloat16), w3.astype(jnp.bfloat16),
                  preferred_element_type=jnp.float32) + b3

    assert logits.shape == (8, OUT_DIM)
    assert jnp.allclose(logits, ref, atol=2e-2, rtol=2e-2)

    print("KERNEL_OK")
</pallas_src>

<mosaic_0001>
module attributes {stable_mosaic.version = 11 : i64} {
  func.func @_mlp_kernel(%arg0: i32, %arg1: memref<16x784xf32, #tpu.memory_space<vmem>>, %arg2: memref<784x512xbf16, #tpu.memory_space<vmem>>, %arg3: memref<1x512xf32, #tpu.memory_space<vmem>>, %arg4: memref<512x512xbf16, #tpu.memory_space<vmem>>, %arg5: memref<1x512xf32, #tpu.memory_space<vmem>>, %arg6: memref<512x128xbf16, #tpu.memory_space<vmem>>, %arg7: memref<1x128xf32, #tpu.memory_space<vmem>>, %arg8: memref<16x128xf32, #tpu.memory_space<vmem>>) attributes {dimension_semantics = [#tpu.dimension_semantics<parallel>], iteration_bounds = array<i64: 1>, scalar_prefetch = 0 : i64, scratch_operands = 0 : i64, tpu.core_type = #tpu.core_type<tc>, window_params = [{transform_indices = @transform_0, window_bounds = array<i64: 16, 784>}, {pipeline_mode = #tpu.pipeline_mode<synchronous>, transform_indices = @transform_1, window_bounds = array<i64: 784, 512>}, {pipeline_mode = #tpu.pipeline_mode<synchronous>, transform_indices = @transform_2, window_bounds = array<i64: 1, 512>}, {pipeline_mode = #tpu.pipeline_mode<synchronous>, transform_indices = @transform_3, window_bounds = array<i64: 512, 512>}, {pipeline_mode = #tpu.pipeline_mode<synchronous>, transform_indices = @transform_4, window_bounds = array<i64: 1, 512>}, {pipeline_mode = #tpu.pipeline_mode<synchronous>, transform_indices = @transform_5, window_bounds = array<i64: 512, 128>}, {pipeline_mode = #tpu.pipeline_mode<synchronous>, transform_indices = @transform_6, window_bounds = array<i64: 1, 128>}, {transform_indices = @transform_7, window_bounds = array<i64: 16, 128>}]} {
    %c0 = arith.constant 0 : index
    %c0_0 = arith.constant 0 : index
    %0 = vector.load %arg1[%c0, %c0_0] : memref<16x784xf32, #tpu.memory_space<vmem>>, vector<16x784xf32>
    %1 = arith.truncf %0 : vector<16x784xf32> to vector<16x784xbf16>
    %c0_1 = arith.constant 0 : index
    %c0_2 = arith.constant 0 : index
    %2 = vector.load %arg2[%c0_1, %c0_2] : memref<784x512xbf16, #tpu.memory_space<vmem>>, vector<784x512xbf16>
    %cst = arith.constant dense<0.000000e+00> : vector<16x512xf32>
    %3 = tpu.matmul %1, %2, %cst {dimension_numbers = #tpu.dot_dimension_numbers<[1], [0], [0], [1], [0, 0, 1, 1], [], []>} : vector<16x784xbf16>, vector<784x512xbf16>, vector<16x512xf32> -> vector<16x512xf32>
    %c0_3 = arith.constant 0 : index
    %c0_4 = arith.constant 0 : index
    %4 = vector.load %arg3[%c0_3, %c0_4] : memref<1x512xf32, #tpu.memory_space<vmem>>, vector<1x512xf32>
    %5 = vector.broadcast %4 : vector<1x512xf32> to vector<16x512xf32>
    %6 = arith.addf %3, %5 : vector<16x512xf32>
    %cst_5 = arith.constant 0.000000e+00 : f32
    %7 = vector.broadcast %cst_5 : f32 to vector<16x512xf32>
    %8 = arith.maximumf %6, %7 : vector<16x512xf32>
    %9 = arith.truncf %8 : vector<16x512xf32> to vector<16x512xbf16>
    %c0_6 = arith.constant 0 : index
    %c0_7 = arith.constant 0 : index
    %10 = vector.load %arg4[%c0_6, %c0_7] : memref<512x512xbf16, #tpu.memory_space<vmem>>, vector<512x512xbf16>
    %cst_8 = arith.constant dense<0.000000e+00> : vector<16x512xf32>
    %11 = tpu.matmul %9, %10, %cst_8 {dimension_numbers = #tpu.dot_dimension_numbers<[1], [0], [0], [1], [0, 0, 1, 1], [], []>} : vector<16x512xbf16>, vector<512x512xbf16>, vector<16x512xf32> -> vector<16x512xf32>
    %c0_9 = arith.constant 0 : index
    %c0_10 = arith.constant 0 : index
    %12 = vector.load %arg5[%c0_9, %c0_10] : memref<1x512xf32, #tpu.memory_space<vmem>>, vector<1x512xf32>
    %13 = vector.broadcast %12 : vector<1x512xf32> to vector<16x512xf32>
    %14 = arith.addf %11, %13 : vector<16x512xf32>
    %cst_11 = arith.constant 0.000000e+00 : f32
    %15 = vector.broadcast %cst_11 : f32 to vector<16x512xf32>
    %16 = arith.maximumf %14, %15 : vector<16x512xf32>
    %17 = arith.truncf %16 : vector<16x512xf32> to vector<16x512xbf16>
    %c0_12 = arith.constant 0 : index
    %c0_13 = arith.constant 0 : index
    %18 = vector.load %arg6[%c0_12, %c0_13] : memref<512x128xbf16, #tpu.memory_space<vmem>>, vector<512x128xbf16>
    %cst_14 = arith.constant dense<0.000000e+00> : vector<16x128xf32>
    %19 = tpu.matmul %17, %18, %cst_14 {dimension_numbers = #tpu.dot_dimension_numbers<[1], [0], [0], [1], [0, 0, 1, 1], [], []>} : vector<16x512xbf16>, vector<512x128xbf16>, vector<16x128xf32> -> vector<16x128xf32>
    %c0_15 = arith.constant 0 : index
    %c0_16 = arith.constant 0 : index
    %20 = vector.load %arg7[%c0_15, %c0_16] : memref<1x128xf32, #tpu.memory_space<vmem>>, vector<1x128xf32>
    %21 = vector.broadcast %20 : vector<1x128xf32> to vector<16x128xf32>
    %22 = arith.addf %19, %21 : vector<16x128xf32>
    %c0_17 = arith.constant 0 : index
    %c0_18 = arith.constant 0 : index
    %23 = vector.load %arg8[%c0_17, %c0_18] : memref<16x128xf32, #tpu.memory_space<vmem>>, vector<16x128xf32>
    tpu.vector_store %arg8[%c0_17, %c0_18], %22 {strides = array<i32>} : memref<16x128xf32, #tpu.memory_space<vmem>>, vector<16x128xf32>,
    return
  }
  func.func @transform_0(%arg0: i32) -> (i32, i32) {
    %c0_i32 = arith.constant 0 : i32
    %c0_i32_0 = arith.constant 0 : i32
    return %arg0, %c0_i32 : i32, i32
  }
  func.func @transform_1(%arg0: i32) -> (i32, i32) {
    %c0_i32 = arith.constant 0 : i32
    %c0_i32_0 = arith.constant 0 : i32
    %c0_i32_1 = arith.constant 0 : i32
    return %c0_i32, %c0_i32_0 : i32, i32
  }
  func.func @transform_2(%arg0: i32) -> (i32, i32) {
    %c0_i32 = arith.constant 0 : i32
    %c0_i32_0 = arith.constant 0 : i32
    %c0_i32_1 = arith.constant 0 : i32
    return %c0_i32, %c0_i32_0 : i32, i32
  }
  func.func @transform_3(%arg0: i32) -> (i32, i32) {
    %c0_i32 = arith.constant 0 : i32
    %c0_i32_0 = arith.constant 0 : i32
    %c0_i32_1 = arith.constant 0 : i32
    return %c0_i32, %c0_i32_0 : i32, i32
  }
  func.func @transform_4(%arg0: i32) -> (i32, i32) {
    %c0_i32 = arith.constant 0 : i32
    %c0_i32_0 = arith.constant 0 : i32
    %c0_i32_1 = arith.constant 0 : i32
    return %c0_i32, %c0_i32_0 : i32, i32
  }
  func.func @transform_5(%arg0: i32) -> (i32, i32) {
    %c0_i32 = arith.constant 0 : i32
    %c0_i32_0 = arith.constant 0 : i32
    %c0_i32_1 = arith.constant 0 : i32
    return %c0_i32, %c0_i32_0 : i32, i32
  }
  func.func @transform_6(%arg0: i32) -> (i32, i32) {
    %c0_i32 = arith.constant 0 : i32
    %c0_i32_0 = arith.constant 0 : i32
    %c0_i32_1 = arith.constant 0 : i32
    return %c0_i32, %c0_i32_0 : i32, i32
  }
  func.func @transform_7(%arg0: i32) -> (i32, i32) {
    %c0_i32 = arith.constant 0 : i32
    %c0_i32_0 = arith.constant 0 : i32
    return %arg0, %c0_i32 : i32, i32
  }
}

</mosaic_0001>

<bundles_post_ra>
// kernel: tpu_custom_call.1
= control target key start
LH: loop header
LB: loop body
LE: loop exit
PB: predicated region body
PF: predicated region fallthrough
CT: control target
= control target key end

     0   :  { %12 = vsyncpa [#allocation3], 0  ;;  %s4267_s0 = inlined_call_operand.hbm [shape: f32[16,784], index: 0, kind: input, shape index: {}]   ;;  %s4268_s1 = inlined_call_operand.hbm [shape: bf16[784,512], index: 1, kind: input, shape index: {}]   ;;  %s4269_s2 = inlined_call_operand.vmem [shape: f32[1,512], index: 2, kind: input, shape index: {}]   ;;  %s4270_s3 = inlined_call_operand.hbm [shape: bf16[512,512], index: 3, kind: input, shape index: {}]   ;;  %s4271_s4 = inlined_call_operand.vmem [shape: f32[1,512], index: 4, kind: input, shape index: {}]   ;;  %s4272_s5 = inlined_call_operand.hbm [shape: bf16[512,128], index: 5, kind: input, shape index: {}]   ;;  %s4273_s6 = inlined_call_operand.vmem [shape: f32[1,128], index: 6, kind: input, shape index: {}]   ;;  %s4274_s7 = inlined_call_operand.hbm [shape: f32[16,128], index: 7, kind: output, shape index: {}]  }
   0x1   :  { %13 = vsyncpa [#allocation6], 0 }
   0x2   :  { %14 = vsyncpa [#allocation9], 0 }
   0x3   :  { %15 = vsyncpa [#allocation4], 0  ;;  %s4103_s24 = smov [#allocation5]   ;;  %s3985_s28 = scalar_lea.hbm %s4268_s1, 25088 }
   0x4   :  { %s33_s25 = sshll.u32 %s4103_s24, 4  ;;  %p3986_p0 = scmp.ne.s32.totalorder %s4268_s1, %s3985_s28  ;;  %s34_s25 = int_to_ptr.vmem [resolvable:$true] %s33_s25 }
   0x5   :  { %p3989_p1 = scmp.lt.u32.totalorder %s3985_s28, %s4268_s1 }
   0x7   :  { %p3991_p2 = pnand %p3989_p1, %p3986_p0 }
   0x9   :  { %3994 = shalt.err (!%p3991_p2)
}
   0xa   :  { %s3995_s10 = scalar_lea.vmem %s34_s25, 25088  ;;  %p4000_p4 = scmp.lt.s32.totalorder %s34_s25, %s34_s25 }
   0xb   :  { %p3996_p3 = scmp.ne.s32.totalorder %s34_s25, %s3995_s10  ;;  %p4001_p5 = scmp.lt.s32.totalorder %s3995_s10, %s3995_s10 }
   0xd   :  { %p4002_p6 = por %p4001_p5, %p4000_p4 }
   0xf   :  { %p4003_p7 = pnand %p4002_p6, %p3996_p3 }
  0x11   :  { %4006 = shalt.err (!%p4003_p7)
}
  0x12   :  { %s4104_s11 = smov 256   ;;  %s4105_s12 = smov 16  }
  0x13   :  { %39 = dma.hbm_to_vmem [thread:$0]  %s4268_s1, 25088, %s34_s25, [#allocation6], %s4104_s11, %s4104_s11, %s4105_s12  }
  0x14   :  { %s4106_s15 = smov [#allocation2]   ;;  %s4007_s19 = scalar_lea.hbm %s4267_s0, 1792 }
  0x15   :  { %s21_s16 = sshll.u32 %s4106_s15, 4  ;;  %p4008_p8 = scmp.ne.s32.totalorder %s4267_s0, %s4007_s19  ;;  %s22_s16 = int_to_ptr.vmem [resolvable:$true] %s21_s16 }
  0x16   :  { %p4011_p9 = scmp.lt.u32.totalorder %s4007_s19, %s4267_s0 }
  0x18   :  { %p4013_p10 = pnand %p4011_p9, %p4008_p8 }
  0x1a   :  { %4016 = shalt.err (!%p4013_p10)
}
  0x1b   :  { %s4017_s24 = scalar_lea.vmem %s22_s16, 1792  ;;  %p4022_p12 = scmp.lt.s32.totalorder %s22_s16, %s22_s16 }
  0x1c   :  { %p4018_p11 = scmp.ne.s32.totalorder %s22_s16, %s4017_s24  ;;  %p4023_p13 = scmp.lt.s32.totalorder %s4017_s24, %s4017_s24 }
  0x1e   :  { %p4024_p0 = por %p4023_p13, %p4022_p12 }
  0x20   :  { %p4025_p1 = pnand %p4024_p0, %p4018_p11 }
  0x22   :  { %4028 = shalt.err (!%p4025_p1)
}
  0x23   :  { %s4107_s1 = smov 896   ;;  %s4108_s25 = smov 56  }
  0x24   :  { %27 = dma.hbm_to_vmem [thread:$0]  %s4267_s0, 1792, %s22_s16, [#allocation3], %s4107_s1, %s4107_s1, %s4108_s25  }
  0x25   :  { %s4109_s28 = smov [#allocation7]   ;;  %s4110_s30 = smov [#allocation8]  }
  0x26   :  { %s47_s29 = sshll.u32 %s4109_s28, 4  ;;  %s61_s8 = sshll.u32 %s4110_s30, 4  ;;  %s48_s29 = int_to_ptr.vmem [resolvable:$true] %s47_s29  ;;  %s4184_s8 = int_to_ptr.vmem [resolvable:$true] %s61_s8 }
  0x27   :  { %s4029_s13 = scalar_lea.hbm %s4270_s3, 16384 }
  0x28   :  { %p4030_p2 = scmp.ne.s32.totalorder %s4270_s3, %s4029_s13  ;;  %p4033_p3 = scmp.lt.u32.totalorder %s4029_s13, %s4270_s3 }
  0x2a   :  { %p4035_p4 = pnand %p4033_p3, %p4030_p2 }
  0x2c   :  { %4038 = shalt.err (!%p4035_p4)
}
  0x2d   :  { %s4039_s0 = scalar_lea.vmem %s48_s29, 16384  ;;  %p4044_p6 = scmp.lt.s32.totalorder %s48_s29, %s48_s29 }
  0x2e   :  { %p4040_p5 = scmp.ne.s32.totalorder %s48_s29, %s4039_s0  ;;  %p4045_p7 = scmp.lt.s32.totalorder %s4039_s0, %s4039_s0 }
  0x30   :  { %p4046_p8 = por %p4045_p7, %p4044_p6 }
  0x32   :  { %p4047_p9 = pnand %p4046_p8, %p4040_p5 }
  0x34   :  { %4050 = shalt.err (!%p4047_p9)
}
  0x35   :  { %53 = dma.hbm_to_vmem [thread:$0]  %s4270_s3, 16384, %s48_s29, [#allocation6], %s4104_s11, %s4104_s11, %s4105_s12  }
  0x36   :  { %s4051_s22 = scalar_lea.hbm %s4272_s5, 4096 }
  0x37   :  { %p4052_p10 = scmp.ne.s32.totalorder %s4272_s5, %s4051_s22  ;;  %p4055_p11 = scmp.lt.u32.totalorder %s4051_s22, %s4272_s5 }
  0x39   :  { %p4057_p12 = pnand %p4055_p11, %p4052_p10 }
  0x3b   :  { %4060 = shalt.err (!%p4057_p12)
}
  0x3c   :  { %s4061_s26 = scalar_lea.vmem %s4184_s8, 4096  ;;  %p4066_p0 = scmp.lt.s32.totalorder %s4184_s8, %s4184_s8 }
  0x3d   :  { %p4062_p13 = scmp.ne.s32.totalorder %s4184_s8, %s4061_s26  ;;  %p4067_p1 = scmp.lt.s32.totalorder %s4061_s26, %s4061_s26 }
  0x3f   :  { %p4068_p2 = por %p4067_p1, %p4066_p0 }
  0x41   :  { %p4069_p3 = pnand %p4068_p2, %p4062_p13 }
  0x43   :  { %4072 = shalt.err (!%p4069_p3)
}
  0x44   :  { %s4111_s3 = smov 64   ;;  %s4112_s11 = smov 4  }
  0x45   :  { %67 = dma.hbm_to_vmem [thread:$0]  %s4272_s5, 4096, %s4184_s8, [#allocation9], %s4111_s3, %s4111_s3, %s4112_s11  }
  0x46   :  { %4095 = dma.done.wait [#allocation3], 1792  }
  0x47   :  { %4096 = vsyncadd [#allocation3], 4294965504 }
  0x48   :  { %4097 = dma.done.wait [#allocation6], 41472  }
  0x49   :  { %4098 = vsyncadd [#allocation6], 4294925824 }
  0x4a   :  { %4099 = dma.done.wait [#allocation9], 4096  }
  0x4b   :  { %4100 = vsyncadd [#allocation9], 4294963200  ;;  %v3467_v0 = vld [vmem:[#allocation5 + $0x4] ss:$16 sps:$4 sm:$0xff]   ;;  %v3469_v1 = vld [vmem:[#allocation5 + $0xc] ss:$16 sps:$4 sm:$0xff]  }
  0x4c   :  { %1306 = vmatprep.subr.bf16.mxu0 %v3467_v0  ;;  %v3471_v2 = vld [vmem:[#allocation5] ss:$16 sps:$4 sm:$0xff]   ;;  %v3472_v3 = vld [vmem:[#allocation5 + $0x8] ss:$16 sps:$4 sm:$0xff]   ;;  %1478 = vmatprep.subr.bf16.mxu1 %v3469_v1  ;;  %v3473_v4 = vld [vmem:[#allocation5 + $0x24] ss:$16 sps:$4 sm:$0xff]  }
  0x4d   :  { %1307 = vmatpush1.bf16.msra.mxu0 %v3471_v2  ;;  %1479 = vmatpush1.bf16.msra.mxu1 %v3472_v3  ;;  %v3475_v5 = vld [vmem:[#allocation5 + $0x2c] ss:$16 sps:$4 sm:$0xff]   ;;  %v3477_v6 = vld [vmem:[#allocation5 + $0x20] ss:$16 sps:$4 sm:$0xff]   ;;  %v3478_v7 = vld [vmem:[#allocation5 + $0x28] ss:$16 sps:$4 sm:$0xff]  }
  0x4e   :  { %1308 = vmatprep.subr.bf16.mxu0 %v3473_v4  ;;  %1480 = vmatprep.subr.bf16.mxu1 %v3475_v5  ;;  %v3479_v8 = vld [vmem:[#allocation5 + $0x44] ss:$16 sps:$4 sm:$0xff]   ;;  %v3481_v9 = vld [vmem:[#allocation5 + $0x4c] ss:$16 sps:$4 sm:$0xff]   ;;  %v3483_v10 = vld [vmem:[#allocation5 + $0x40] ss:$16 sps:$4 sm:$0xff]  }
  0x4f   :  { %v3484_v11 = vld [vmem:[#allocation5 + $0x48] ss:$16 sps:$4 sm:$0xff]   ;;  %v3485_v12 = vld [vmem:[#allocation5 + $0x64] ss:$16 sps:$4 sm:$0xff]   ;;  %v3487_v13 = vld [vmem:[#allocation5 + $0x6c] ss:$16 sps:$4 sm:$0xff]  }
  0x50   :  { %v3489_v14 = vld [vmem:[#allocation5 + $0x60] ss:$16 sps:$4 sm:$0xff]   ;;  %v3490_v15 = vld [vmem:[#allocation5 + $0x68] ss:$16 sps:$4 sm:$0xff]   ;;  %v3491_v16 = vld [vmem:[#allocation5 + $0x84] ss:$16 sps:$4 sm:$0xff]  }
  0x51   :  { %1309 = vmatpush1.bf16.msra.mxu0 %v3477_v6  ;;  %1481 = vmatpush1.bf16.msra.mxu1 %v3478_v7  ;;  %v3493_v17 = vld [vmem:[#allocation5 + $0x8c] ss:$16 sps:$4 sm:$0xff]   ;;  %v3495_v18 = vld [vmem:[#allocation5 + $0x80] ss:$16 sps:$4 sm:$0xff]   ;;  %v3496_v19 = vld [vmem:[#allocation5 + $0x88] ss:$16 sps:$4 sm:$0xff]  }
  0x52   :  { %1310 = vmatprep.subr.bf16.mxu0 %v3479_v8  ;;  %1482 = vmatprep.subr.bf16.mxu1 %v3481_v9  ;;  %v3497_v20 = vld [vmem:[#allocation5 + $0xa4] ss:$16 sps:$4 sm:$0xff]   ;;  %v3499_v21 = vld [vmem:[#allocation5 + $0xac] ss:$16 sps:$4 sm:$0xff]   ;;  %v3501_v22 = vld [vmem:[#allocation5 + $0xa0] ss:$16 sps:$4 sm:$0xff]  }
  0x53   :  { %v3502_v23 = vld [vmem:[#allocation5 + $0xa8] ss:$16 sps:$4 sm:$0xff]   ;;  %v3503_v24 = vld [vmem:[#allocation5 + $0xc4] ss:$16 sps:$4 sm:$0xff]   ;;  %v3505_v25 = vld [vmem:[#allocation5 + $0xcc] ss:$16 sps:$4 sm:$0xff]  }
  0x54   :  { %v3507_v26 = vld [vmem:[#allocation5 + $0xc0] ss:$16 sps:$4 sm:$0xff]   ;;  %v3508_v27 = vld [vmem:[#allocation5 + $0xc8] ss:$16 sps:$4 sm:$0xff]   ;;  %v3509_v28 = vld [vmem:[#allocation5 + $0xe4] ss:$16 sps:$4 sm:$0xff]  }
  0x55   :  { %1311 = vmatpush1.bf16.msra.mxu0 %v3483_v10  ;;  %1483 = vmatpush1.bf16.msra.mxu1 %v3484_v11  ;;  %v3511_v29 = vld [vmem:[#allocation5 + $0xec] ss:$16 sps:$4 sm:$0xff]   ;;  %v3513_v30 = vld [vmem:[#allocation5 + $0xe0] ss:$16 sps:$4 sm:$0xff]   ;;  %v3514_v31 = vld [vmem:[#allocation5 + $0xe8] ss:$16 sps:$4 sm:$0xff]  }
  0x56   :  { %1312 = vmatprep.subr.bf16.mxu0 %v3485_v12  ;;  %1484 = vmatprep.subr.bf16.mxu1 %v3487_v13  ;;  %v3515_v32 = vld [vmem:[#allocation5 + $0x104] ss:$16 sps:$4 sm:$0xff]   ;;  %v3517_v33 = vld [vmem:[#allocation5 + $0x10c] ss:$16 sps:$4 sm:$0xff]   ;;  %v3519_v34 = vld [vmem:[#allocation5 + $0x100] ss:$16 sps:$4 sm:$0xff]  }
  0x57   :  { %v3520_v35 = vld [vmem:[#allocation5 + $0x108] ss:$16 sps:$4 sm:$0xff]   ;;  %v3521_v36 = vld [vmem:[#allocation5 + $0x124] ss:$16 sps:$4 sm:$0xff]   ;;  %v3523_v37 = vld [vmem:[#allocation5 + $0x12c] ss:$16 sps:$4 sm:$0xff]  }
  0x58   :  { %v3525_v38 = vld [vmem:[#allocation5 + $0x120] ss:$16 sps:$4 sm:$0xff]   ;;  %v3526_v39 = vld [vmem:[#allocation5 + $0x128] ss:$16 sps:$4 sm:$0xff]   ;;  %v3527_v40 = vld [vmem:[#allocation5 + $0x144] ss:$16 sps:$4 sm:$0xff]  }
  0x59   :  { %1313 = vmatpush1.bf16.msra.mxu0 %v3489_v14  ;;  %1485 = vmatpush1.bf16.msra.mxu1 %v3490_v15  ;;  %v3529_v41 = vld [vmem:[#allocation5 + $0x14c] ss:$16 sps:$4 sm:$0xff]   ;;  %v3531_v42 = vld [vmem:[#allocation5 + $0x140] ss:$16 sps:$4 sm:$0xff]   ;;  %v3532_v43 = vld [vmem:[#allocation5 + $0x148] ss:$16 sps:$4 sm:$0xff]  }
  0x5a   :  { %1314 = vmatprep.subr.bf16.mxu0 %v3491_v16  ;;  %1486 = vmatprep.subr.bf16.mxu1 %v3493_v17  ;;  %v3533_v44 = vld [vmem:[#allocation5 + $0x164] ss:$16 sps:$4 sm:$0xff]   ;;  %v3535_v45 = vld [vmem:[#allocation5 + $0x16c] ss:$16 sps:$4 sm:$0xff]   ;;  %v3537_v48 = vld [vmem:[#allocation5 + $0x160] ss:$16 sps:$4 sm:$0xff]  }
  0x5b   :  { %v84_v46 = vld [vmem:[#allocation2 + $0x8] sm:$0xff]  ;;  %v91_v47 = vld [vmem:[#allocation2 + $0x40] sm:$0xff]  ;;  %v90_v5 = vld [vmem:[#allocation2 + $0x38] sm:$0xff]  ;;  %vm1302_vm0 = vcmask 130048   ;;  %s4114_s8 = smov [#allocation10]  }
  0x5c   :  { %v3538_v49 = vld [vmem:[#allocation5 + $0x168] ss:$16 sps:$4 sm:$0xff]   ;;  %v98_v50 = vpack.c.bf16 %v91_v47, %v84_v46  ;;  %v3539_v51 = vld [vmem:[#allocation5 + $0x184] ss:$16 sps:$4 sm:$0xff]   ;;  %v3541_v52 = vld [vmem:[#allocation5 + $0x18c] ss:$16 sps:$4 sm:$0xff]  }
  0x5d   :  { %1315 = vmatpush1.bf16.msra.mxu0 %v3495_v18  ;;  %1487 = vmatpush1.bf16.msra.mxu1 %v3496_v19  ;;  %v3543_v53 = vld [vmem:[#allocation5 + $0x180] ss:$16 sps:$4 sm:$0xff]   ;;  %v3544_v54 = vld [vmem:[#allocation5 + $0x188] ss:$16 sps:$4 sm:$0xff]   ;;  %v3545_v55 = vld [vmem:[#allocation5 + $0x1a4] ss:$16 sps:$4 sm:$0xff]  }
  0x5e   :  { %1316 = vmatprep.subr.bf16.mxu0 %v3497_v20  ;;  %1488 = vmatprep.subr.bf16.mxu1 %v3499_v21  ;;  %v3547_v56 = vld [vmem:[#allocation5 + $0x1ac] ss:$16 sps:$4 sm:$0xff]   ;;  %v3549_v57 = vld [vmem:[#allocation5 + $0x1a0] ss:$16 sps:$4 sm:$0xff]   ;;  %v3550_v58 = vld [vmem:[#allocation5 + $0x1a8] ss:$16 sps:$4 sm:$0xff]  }
  0x5f   :  { %1338 = vmatprep.mubr.bf16.mxu0 %v98_v50  ;;  %1510 = vmatprep.mubr.bf16.mxu1 %v98_v50  ;;  %v3551_v59 = vld [vmem:[#allocation5 + $0x1c4] ss:$16 sps:$4 sm:$0xff]   ;;  %v3553_v60 = vld [vmem:[#allocation5 + $0x1cc] ss:$16 sps:$4 sm:$0xff]   ;;  %v3555_v61 = vld [vmem:[#allocation5 + $0x1c0] ss:$16 sps:$4 sm:$0xff]  }
  0x60   :  { %v3556_v62 = vld [vmem:[#allocation5 + $0x1c8] ss:$16 sps:$4 sm:$0xff]   ;;  %v3557_v63 = vld [vmem:[#allocation5 + $0x1e4] ss:$16 sps:$4 sm:$0xff]   ;;  %v3559_v0 = vld [vmem:[#allocation5 + $0x1ec] ss:$16 sps:$4 sm:$0xff]  }
  0x61   :  { %1317 = vmatpush1.bf16.msra.mxu0 %v3501_v22  ;;  %1489 = vmatpush1.bf16.msra.mxu1 %v3502_v23  ;;  %v3561_v1 = vld [vmem:[#allocation5 + $0x1e0] ss:$16 sps:$4 sm:$0xff]   ;;  %v3562_v2 = vld [vmem:[#allocation5 + $0x1e8] ss:$16 sps:$4 sm:$0xff]   ;;  %v3565_v3 = vld [vmem:[#allocation5 + $0x204] ss:$16 sps:$4 sm:$0xff]  }
  0x62   :  { %1318 = vmatprep.subr.bf16.mxu0 %v3503_v24  ;;  %1490 = vmatprep.subr.bf16.mxu1 %v3505_v25  ;;  %v83_v4 = vld [vmem:[#allocation2] sm:$0xff]  ;;  %v3568_v6 = vld [vmem:[#allocation5 + $0x20c] ss:$16 sps:$4 sm:$0xff]   ;;  %v3566_v8 = vld [vmem:[#allocation5 + $0x208] ss:$16 sps:$4 sm:$0xff]   ;;  %s2988_s9 = sshll.u32 %s4114_s8, 4  ;;  %s2989_s9 = int_to_ptr.vmem [resolvable:$true] %s2988_s9 }
  0x63   :  { %v3563_v7 = vld [vmem:[#allocation5 + $0x200] ss:$16 sps:$4 sm:$0xff]   ;;  %v97_v9 = vpack.c.bf16 %v90_v5, %v83_v4  ;;  %v3571_v10 = vld [vmem:[#allocation5 + $0x224] ss:$16 sps:$4 sm:$0xff]   ;;  %v3574_v11 = vld [vmem:[#allocation5 + $0x22c] ss:$16 sps:$4 sm:$0xff]   ;;  %p4078_p5 = scmp.lt.s32.totalorder %s2989_s9, %s2989_s9 }
  0x64   :  { %v3569_v12 = vld [vmem:[#allocation5 + $0x220] ss:$16 sps:$4 sm:$0xff]   ;;  %v3572_v13 = vld [vmem:[#allocation5 + $0x228] ss:$16 sps:$4 sm:$0xff]   ;;  %v3577_v14 = vld [vmem:[#allocation5 + $0x244] ss:$16 sps:$4 sm:$0xff]  }
  0x65   :  { %1319 = vmatpush1.bf16.msra.mxu0 %v3507_v26  ;;  %1491 = vmatpush1.bf16.msra.mxu1 %v3508_v27  ;;  %v3580_v15 = vld [vmem:[#allocation5 + $0x24c] ss:$16 sps:$4 sm:$0xff]   ;;  %v3575_v16 = vld [vmem:[#allocation5 + $0x240] ss:$16 sps:$4 sm:$0xff]   ;;  %v3578_v17 = vld [vmem:[#allocation5 + $0x248] ss:$16 sps:$4 sm:$0xff]  }
  0x66   :  { %1320 = vmatprep.subr.bf16.mxu0 %v3509_v28  ;;  %1492 = vmatprep.subr.bf16.mxu1 %v3511_v29  ;;  %v3583_v18 = vld [vmem:[#allocation5 + $0x264] ss:$16 sps:$4 sm:$0xff]   ;;  %v3586_v19 = vld [vmem:[#allocation5 + $0x26c] ss:$16 sps:$4 sm:$0xff]   ;;  %v3581_v20 = vld [vmem:[#allocation5 + $0x260] ss:$16 sps:$4 sm:$0xff]  }
  0x67   :  { %v3584_v21 = vld [vmem:[#allocation5 + $0x268] ss:$16 sps:$4 sm:$0xff]   ;;  %v3589_v22 = vld [vmem:[#allocation5 + $0x284] ss:$16 sps:$4 sm:$0xff]   ;;  %v3592_v23 = vld [vmem:[#allocation5 + $0x28c] ss:$16 sps:$4 sm:$0xff]  }
  0x68   :  { %v3587_v24 = vld [vmem:[#allocation5 + $0x280] ss:$16 sps:$4 sm:$0xff]   ;;  %v3590_v25 = vld [vmem:[#allocation5 + $0x288] ss:$16 sps:$4 sm:$0xff]   ;;  %v3595_v26 = vld [vmem:[#allocation5 + $0x2a4] ss:$16 sps:$4 sm:$0xff]  }
  0x69   :  { %1321 = vmatpush1.bf16.msra.mxu0 %v3513_v30  ;;  %1493 = vmatpush1.bf16.msra.mxu1 %v3514_v31  ;;  %v3598_v27 = vld [vmem:[#allocation5 + $0x2ac] ss:$16 sps:$4 sm:$0xff]   ;;  %v3593_v28 = vld [vmem:[#allocation5 + $0x2a0] ss:$16 sps:$4 sm:$0xff]   ;;  %v3596_v29 = vld [vmem:[#allocation5 + $0x2a8] ss:$16 sps:$4 sm:$0xff]  }
  0x6a   :  { %1322 = vmatprep.subr.bf16.mxu0 %v3515_v32  ;;  %1494 = vmatprep.subr.bf16.mxu1 %v3517_v33  ;;  %v3601_v30 = vld [vmem:[#allocation5 + $0x2c4] ss:$16 sps:$4 sm:$0xff]   ;;  %v3604_v31 = vld [vmem:[#allocation5 + $0x2cc] ss:$16 sps:$4 sm:$0xff]   ;;  %v3617_v47 = vld [vmem:[#allocation5 + $0x320] ss:$16 sps:$4 sm:$0xff]  }
  0x6b   :  { %v86_v32 = vld [vmem:[#allocation2 + $0x18] sm:$0xff]  ;;  %v93_v33 = vld [vmem:[#allocation2 + $0x50] sm:$0xff] }
  0x6c   :  { %v3622_v46 = vld [vmem:[#allocation5 + $0x32c] ss:$16 sps:$4 sm:$0xff]   ;;  %v3650_v4 = vld [vmem:[#allocation5 + $0x3c8] ss:$16 sps:$4 sm:$0xff]   ;;  %v3655_v5 = vld [vmem:[#allocation5 + $0x3e4] ss:$16 sps:$4 sm:$0xff]  }
  0x6d   :  { %1323 = vmatpush1.bf16.msra.mxu0 %v3519_v34  ;;  %1495 = vmatpush1.bf16.msra.mxu1 %v3520_v35  ;;  %v3599_v34 = vld [vmem:[#allocation5 + $0x2c0] ss:$16 sps:$4 sm:$0xff]   ;;  %v3602_v35 = vld [vmem:[#allocation5 + $0x2c8] ss:$16 sps:$4 sm:$0xff]   ;;  %v3628_v50 = vld [vmem:[#allocation5 + $0x34c] ss:$16 sps:$4 sm:$0xff]  }
  0x6e   :  { %1324 = vmatprep.subr.bf16.mxu0 %v3521_v36  ;;  %1496 = vmatprep.subr.bf16.mxu1 %v3523_v37  ;;  %v100_v36 = vpack.c.bf16 %v93_v33, %v86_v32  ;;  %v3607_v37 = vld [vmem:[#allocation5 + $0x2e4] ss:$16 sps:$4 sm:$0xff]   ;;  %v3688_v32 = vld [vmem:[#allocation5 + $0x48c] ss:$16 sps:$4 sm:$0xff]   ;;  %v3683_v33 = vld [vmem:[#allocation5 + $0x480] ss:$16 sps:$4 sm:$0xff]  }
  0x71   :  { %1325 = vmatpush1.bf16.msra.mxu0 %v3525_v38  ;;  %1497 = vmatpush1.bf16.msra.mxu1 %v3526_v39  ;;  %v3610_v38 = vld [vmem:[#allocation5 + $0x2ec] ss:$16 sps:$4 sm:$0xff]   ;;  %v3605_v39 = vld [vmem:[#allocation5 + $0x2e0] ss:$16 sps:$4 sm:$0xff]  }
  0x72   :  { %1326 = vmatprep.subr.bf16.mxu0 %v3527_v40  ;;  %1498 = vmatprep.subr.bf16.mxu1 %v3529_v41  ;;  %v3608_v40 = vld [vmem:[#allocation5 + $0x2e8] ss:$16 sps:$4 sm:$0xff]   ;;  %v3613_v41 = vld [vmem:[#allocation5 + $0x304] ss:$16 sps:$4 sm:$0xff]  }
  0x75   :  { %1327 = vmatpush1.bf16.msra.mxu0 %v3531_v42  ;;  %1499 = vmatpush1.bf16.msra.mxu1 %v3532_v43  ;;  %v3616_v42 = vld [vmem:[#allocation5 + $0x30c] ss:$16 sps:$4 sm:$0xff]   ;;  %v3611_v43 = vld [vmem:[#allocation5 + $0x300] ss:$16 sps:$4 sm:$0xff]  }
  0x76   :  { %1328 = vmatprep.subr.bf16.mxu0 %v3533_v44  ;;  %1500 = vmatprep.subr.bf16.mxu1 %v3535_v45  ;;  %v3614_v44 = vld [vmem:[#allocation5 + $0x308] ss:$16 sps:$4 sm:$0xff]   ;;  %v3619_v45 = vld [vmem:[#allocation5 + $0x324] ss:$16 sps:$4 sm:$0xff]  }
  0x79   :  { %1329 = vmatpush1.bf16.msra.mxu0 %v3537_v48  ;;  %1501 = vmatpush1.bf16.msra.mxu1 %v3538_v49  ;;  %v3620_v48 = vld [vmem:[#allocation5 + $0x328] ss:$16 sps:$4 sm:$0xff]   ;;  %v3625_v49 = vld [vmem:[#allocation5 + $0x344] ss:$16 sps:$4 sm:$0xff]  }
  0x7a   :  { %1330 = vmatprep.subr.bf16.mxu0 %v3539_v51  ;;  %1502 = vmatprep.subr.bf16.mxu1 %v3541_v52  ;;  %v3623_v51 = vld [vmem:[#allocation5 + $0x340] ss:$16 sps:$4 sm:$0xff]   ;;  %v3626_v52 = vld [vmem:[#allocation5 + $0x348] ss:$16 sps:$4 sm:$0xff]  }
  0x7d   :  { %1331 = vmatpush1.bf16.msra.mxu0 %v3543_v53  ;;  %1503 = vmatpush1.bf16.msra.mxu1 %v3544_v54  ;;  %v3631_v53 = vld [vmem:[#allocation5 + $0x364] ss:$16 sps:$4 sm:$0xff]   ;;  %v3634_v54 = vld [vmem:[#allocation5 + $0x36c] ss:$16 sps:$4 sm:$0xff]  }
  0x7e   :  { %1332 = vmatprep.subr.bf16.mxu0 %v3545_v55  ;;  %1504 = vmatprep.subr.bf16.mxu1 %v3547_v56  ;;  %v3629_v55 = vld [vmem:[#allocation5 + $0x360] ss:$16 sps:$4 sm:$0xff]   ;;  %v3632_v56 = vld [vmem:[#allocation5 + $0x368] ss:$16 sps:$4 sm:$0xff]  }
  0x81   :  { %1333 = vmatpush1.bf16.msra.mxu0 %v3549_v57  ;;  %1505 = vmatpush1.bf16.msra.mxu1 %v3550_v58  ;;  %v3637_v57 = vld [vmem:[#allocation5 + $0x384] ss:$16 sps:$4 sm:$0xff]   ;;  %v3640_v58 = vld [vmem:[#allocation5 + $0x38c] ss:$16 sps:$4 sm:$0xff]  }
  0x82   :  { %1334 = vmatprep.subr.bf16.mxu0 %v3551_v59  ;;  %1506 = vmatprep.subr.bf16.mxu1 %v3553_v60  ;;  %v3635_v59 = vld [vmem:[#allocation5 + $0x380] ss:$16 sps:$4 sm:$0xff]   ;;  %v3638_v60 = vld [vmem:[#allocation5 + $0x388] ss:$16 sps:$4 sm:$0xff]  }
  0x85   :  { %1335 = vmatpush1.bf16.msra.mxu0 %v3555_v61  ;;  %1507 = vmatpush1.bf16.msra.mxu1 %v3556_v62  ;;  %v3643_v61 = vld [vmem:[#allocation5 + $0x3a4] ss:$16 sps:$4 sm:$0xff]   ;;  %v3646_v62 = vld [vmem:[#allocation5 + $0x3ac] ss:$16 sps:$4 sm:$0xff]  }
  0x86   :  { %1336 = vmatprep.subr.bf16.mxu0 %v3557_v63  ;;  %1508 = vmatprep.subr.bf16.mxu1 %v3559_v0  ;;  %v3641_v63 = vld [vmem:[#allocation5 + $0x3a0] ss:$16 sps:$4 sm:$0xff]   ;;  %v3644_v0 = vld [vmem:[#allocation5 + $0x3a8] ss:$16 sps:$4 sm:$0xff]  }
  0x89   :  { %1337 = vmatpush1.bf16.msra.mxu0 %v3561_v1  ;;  %1509 = vmatpush1.bf16.msra.mxu1 %v3562_v2  ;;  %v3649_v1 = vld [vmem:[#allocation5 + $0x3c4] ss:$16 sps:$4 sm:$0xff]   ;;  %v3652_v2 = vld [vmem:[#allocation5 + $0x3cc] ss:$16 sps:$4 sm:$0xff]  }
  0x8a   :  { %1349 = vmatprep.subr.bf16.mxu0 %v3565_v3  ;;  %1521 = vmatprep.subr.bf16.mxu1 %v3568_v6  ;;  %v3647_v3 = vld [vmem:[#allocation5 + $0x3c0] ss:$16 sps:$4 sm:$0xff]   ;;  %v3658_v6 = vld [vmem:[#allocation5 + $0x3ec] ss:$16 sps:$4 sm:$0xff]  }
  0x8c   :  { %1339 = vmatmul.mubr.bf16.vlgmr.msra.gmra.mrb[0].mxu0 %v97_v9  ;;  %1511 = vmatmul.mubr.bf16.vlgmr.msra.gmra.mrb[0].mxu1 %v97_v9  ;;  %v3661_v9 = vld [vmem:[#allocation5 + $0x404] ss:$16 sps:$4 sm:$0xff]  }
  0x8d   :  { %1350 = vmatpush1.bf16.msra.mxu0 %v3563_v7  ;;  %1522 = vmatpush1.bf16.msra.mxu1 %v3566_v8  ;;  %v3653_v7 = vld [vmem:[#allocation5 + $0x3e0] ss:$16 sps:$4 sm:$0xff]   ;;  %v3656_v8 = vld [vmem:[#allocation5 + $0x3e8] ss:$16 sps:$4 sm:$0xff]  }
  0x8e   :  { %1351 = vmatprep.subr.bf16.mxu0 %v3571_v10  ;;  %1523 = vmatprep.subr.bf16.mxu1 %v3574_v11  ;;  %v85_v10 = vld [vmem:[#allocation2 + $0x10] sm:$0xff]  ;;  %v92_v11 = vld [vmem:[#allocation2 + $0x48] sm:$0xff] }
  0x8f   :  { %1381 = vmatprep.mubr.bf16.mxu0 %v100_v36  ;;  %1553 = vmatprep.mubr.bf16.mxu1 %v100_v36  ;;  %v3694_v36 = vld [vmem:[#allocation5 + $0x4ac] ss:$16 sps:$4 sm:$0xff]  }
  0x91   :  { %1352 = vmatpush1.bf16.msra.mxu0 %v3569_v12  ;;  %1524 = vmatpush1.bf16.msra.mxu1 %v3572_v13  ;;  %v3664_v12 = vld [vmem:[#allocation5 + $0x40c] ss:$16 sps:$4 sm:$0xff]   ;;  %v3659_v13 = vld [vmem:[#allocation5 + $0x400] ss:$16 sps:$4 sm:$0xff]  }
  0x92   :  { %1353 = vmatprep.subr.bf16.mxu0 %v3577_v14  ;;  %1525 = vmatprep.subr.bf16.mxu1 %v3580_v15  ;;  %v3662_v14 = vld [vmem:[#allocation5 + $0x408] ss:$16 sps:$4 sm:$0xff]   ;;  %v99_v15 = vpack.c.bf16 %v92_v11, %v85_v10  ;;  %v3751_v11 = vld [vmem:[#allocation5 + $0x5e4] ss:$16 sps:$4 sm:$0xff]  }
  0x93   :  { %v3746_v10 = vld [vmem:[#allocation5 + $0x5c8] ss:$16 sps:$4 sm:$0xff]  }
  0x95   :  { %1354 = vmatpush1.bf16.msra.mxu0 %v3575_v16  ;;  %1526 = vmatpush1.bf16.msra.mxu1 %v3578_v17  ;;  %v3667_v16 = vld [vmem:[#allocation5 + $0x424] ss:$16 sps:$4 sm:$0xff]   ;;  %v3670_v17 = vld [vmem:[#allocation5 + $0x42c] ss:$16 sps:$4 sm:$0xff]  }
  0x96   :  { %1355 = vmatprep.subr.bf16.mxu0 %v3583_v18  ;;  %1527 = vmatprep.subr.bf16.mxu1 %v3586_v19  ;;  %v88_v18 = vld [vmem:[#allocation2 + $0x28] sm:$0xff]  ;;  %v3665_v19 = vld [vmem:[#allocation5 + $0x420] ss:$16 sps:$4 sm:$0xff]  }
  0x99   :  { %1356 = vmatpush1.bf16.msra.mxu0 %v3581_v20  ;;  %1528 = vmatpush1.bf16.msra.mxu1 %v3584_v21  ;;  %v3668_v20 = vld [vmem:[#allocation5 + $0x428] ss:$16 sps:$4 sm:$0xff]   ;;  %v95_v21 = vld [vmem:[#allocation2 + $0x60] sm:$0xff] }
  0x9a   :  { %1357 = vmatprep.subr.bf16.mxu0 %v3589_v22  ;;  %1529 = vmatprep.subr.bf16.mxu1 %v3592_v23  ;;  %v3673_v22 = vld [vmem:[#allocation5 + $0x444] ss:$16 sps:$4 sm:$0xff]   ;;  %v102_v23 = vpack.c.bf16 %v95_v21, %v88_v18  ;;  %v3760_v18 = vld [vmem:[#allocation5 + $0x60c] ss:$16 sps:$4 sm:$0xff]  }
  0x9d   :  { %1358 = vmatpush1.bf16.msra.mxu0 %v3587_v24  ;;  %1530 = vmatpush1.bf16.msra.mxu1 %v3590_v25  ;;  %v3676_v24 = vld [vmem:[#allocation5 + $0x44c] ss:$16 sps:$4 sm:$0xff]   ;;  %v3671_v25 = vld [vmem:[#allocation5 + $0x440] ss:$16 sps:$4 sm:$0xff]  }
  0x9e   :  { %1359 = vmatprep.subr.bf16.mxu0 %v3595_v26  ;;  %1531 = vmatprep.subr.bf16.mxu1 %v3598_v27  ;;  %v3674_v26 = vld [vmem:[#allocation5 + $0x448] ss:$16 sps:$4 sm:$0xff]   ;;  %v3679_v27 = vld [vmem:[#allocation5 + $0x464] ss:$16 sps:$4 sm:$0xff]  }
  0xa1   :  { %1360 = vmatpush1.bf16.msra.mxu0 %v3593_v28  ;;  %1532 = vmatpush1.bf16.msra.mxu1 %v3596_v29  ;;  %v3682_v28 = vld [vmem:[#allocation5 + $0x46c] ss:$16 sps:$4 sm:$0xff]   ;;  %v3677_v29 = vld [vmem:[#allocation5 + $0x460] ss:$16 sps:$4 sm:$0xff]  }
  0xa2   :  { %1361 = vmatprep.subr.bf16.mxu0 %v3601_v30  ;;  %1533 = vmatprep.subr.bf16.mxu1 %v3604_v31  ;;  %v3680_v30 = vld [vmem:[#allocation5 + $0x468] ss:$16 sps:$4 sm:$0xff]   ;;  %v3685_v31 = vld [vmem:[#allocation5 + $0x484] ss:$16 sps:$4 sm:$0xff]  }
  0xa5   :  { %1362 = vmatpush1.bf16.msra.mxu0 %v3599_v34  ;;  %1534 = vmatpush1.bf16.msra.mxu1 %v3602_v35  ;;  %v3686_v34 = vld [vmem:[#allocation5 + $0x488] ss:$16 sps:$4 sm:$0xff]   ;;  %v3691_v35 = vld [vmem:[#allocation5 + $0x4a4] ss:$16 sps:$4 sm:$0xff]  }
  0xa6   :  { %1363 = vmatprep.subr.bf16.mxu0 %v3607_v37  ;;  %1535 = vmatprep.subr.bf16.mxu1 %v3610_v38  ;;  %v3689_v37 = vld [vmem:[#allocation5 + $0x4a0] ss:$16 sps:$4 sm:$0xff]   ;;  %v3692_v38 = vld [vmem:[#allocation5 + $0x4a8] ss:$16 sps:$4 sm:$0xff]  }
  0xa9   :  { %1364 = vmatpush1.bf16.msra.mxu0 %v3605_v39  ;;  %1536 = vmatpush1.bf16.msra.mxu1 %v3608_v40  ;;  %v3697_v39 = vld [vmem:[#allocation5 + $0x4c4] ss:$16 sps:$4 sm:$0xff]   ;;  %v3700_v40 = vld [vmem:[#allocation5 + $0x4cc] ss:$16 sps:$4 sm:$0xff]  }
  0xaa   :  { %1365 = vmatprep.subr.bf16.mxu0 %v3613_v41  ;;  %1537 = vmatprep.subr.bf16.mxu1 %v3616_v42  ;;  %v3695_v41 = vld [vmem:[#allocation5 + $0x4c0] ss:$16 sps:$4 sm:$0xff]   ;;  %v3698_v42 = vld [vmem:[#allocation5 + $0x4c8] ss:$16 sps:$4 sm:$0xff]  }
  0xad   :  { %1366 = vmatpush1.bf16.msra.mxu0 %v3611_v43  ;;  %1538 = vmatpush1.bf16.msra.mxu1 %v3614_v44  ;;  %v3703_v43 = vld [vmem:[#allocation5 + $0x4e4] ss:$16 sps:$4 sm:$0xff]   ;;  %v3706_v44 = vld [vmem:[#allocation5 + $0x4ec] ss:$16 sps:$4 sm:$0xff]  }
  0xae   :  { %1367 = vmatprep.subr.bf16.mxu0 %v3619_v45  ;;  %1539 = vmatprep.subr.bf16.mxu1 %v3622_v46  ;;  %v3701_v45 = vld [vmem:[#allocation5 + $0x4e0] ss:$16 sps:$4 sm:$0xff]   ;;  %v3704_v46 = vld [vmem:[#allocation5 + $0x4e8] ss:$16 sps:$4 sm:$0xff]  }
  0xb1   :  { %1368 = vmatpush1.bf16.msra.mxu0 %v3617_v47  ;;  %1540 = vmatpush1.bf16.msra.mxu1 %v3620_v48  ;;  %v3709_v47 = vld [vmem:[#allocation5 + $0x504] ss:$16 sps:$4 sm:$0xff]   ;;  %v3712_v48 = vld [vmem:[#allocation5 + $0x50c] ss:$16 sps:$4 sm:$0xff]  }
  0xb2   :  { %1369 = vmatprep.subr.bf16.mxu0 %v3625_v49  ;;  %1541 = vmatprep.subr.bf16.mxu1 %v3628_v50  ;;  %v3707_v49 = vld [vmem:[#allocation5 + $0x500] ss:$16 sps:$4 sm:$0xff]   ;;  %v3710_v50 = vld [vmem:[#allocation5 + $0x508] ss:$16 sps:$4 sm:$0xff]  }
  0xb5   :  { %1370 = vmatpush1.bf16.msra.mxu0 %v3623_v51  ;;  %1542 = vmatpush1.bf16.msra.mxu1 %v3626_v52  ;;  %v3715_v51 = vld [vmem:[#allocation5 + $0x524] ss:$16 sps:$4 sm:$0xff]   ;;  %v3718_v52 = vld [vmem:[#allocation5 + $0x52c] ss:$16 sps:$4 sm:$0xff]  }
  0xb6   :  { %1371 = vmatprep.subr.bf16.mxu0 %v3631_v53  ;;  %1543 = vmatprep.subr.bf16.mxu1 %v3634_v54  ;;  %v3713_v53 = vld [vmem:[#allocation5 + $0x520] ss:$16 sps:$4 sm:$0xff]   ;;  %v3716_v54 = vld [vmem:[#allocation5 + $0x528] ss:$16 sps:$4 sm:$0xff]  }
  0xb9   :  { %1372 = vmatpush1.bf16.msra.mxu0 %v3629_v55  ;;  %1544 = vmatpush1.bf16.msra.mxu1 %v3632_v56  ;;  %v3721_v55 = vld [vmem:[#allocation5 + $0x544] ss:$16 sps:$4 sm:$0xff]   ;;  %v3724_v56 = vld [vmem:[#allocation5 + $0x54c] ss:$16 sps:$4 sm:$0xff]  }
  0xba   :  { %1373 = vmatprep.subr.bf16.mxu0 %v3637_v57  ;;  %1545 = vmatprep.subr.bf16.mxu1 %v3640_v58  ;;  %v3719_v57 = vld [vmem:[#allocation5 + $0x540] ss:$16 sps:$4 sm:$0xff]   ;;  %v3722_v58 = vld [vmem:[#allocation5 + $0x548] ss:$16 sps:$4 sm:$0xff]  }
  0xbd   :  { %1374 = vmatpush1.bf16.msra.mxu0 %v3635_v59  ;;  %1546 = vmatpush1.bf16.msra.mxu1 %v3638_v60  ;;  %v3727_v59 = vld [vmem:[#allocation5 + $0x564] ss:$16 sps:$4 sm:$0xff]   ;;  %v3730_v60 = vld [vmem:[#allocation5 + $0x56c] ss:$16 sps:$4 sm:$0xff]  }
  0xbe   :  { %1375 = vmatprep.subr.bf16.mxu0 %v3643_v61  ;;  %1547 = vmatprep.subr.bf16.mxu1 %v3646_v62  ;;  %v3725_v61 = vld [vmem:[#allocation5 + $0x560] ss:$16 sps:$4 sm:$0xff]   ;;  %v3728_v62 = vld [vmem:[#allocation5 + $0x568] ss:$16 sps:$4 sm:$0xff]  }
  0xc1   :  { %1376 = vmatpush1.bf16.msra.mxu0 %v3641_v63  ;;  %1548 = vmatpush1.bf16.msra.mxu1 %v3644_v0  ;;  %v3733_v63 = vld [vmem:[#allocation5 + $0x584] ss:$16 sps:$4 sm:$0xff]   ;;  %v3736_v0 = vld [vmem:[#allocation5 + $0x58c] ss:$16 sps:$4 sm:$0xff]  }
  0xc2   :  { %1377 = vmatprep.subr.bf16.mxu0 %v3649_v1  ;;  %1549 = vmatprep.subr.bf16.mxu1 %v3652_v2  ;;  %v3731_v1 = vld [vmem:[#allocation5 + $0x580] ss:$16 sps:$4 sm:$0xff]   ;;  %v3734_v2 = vld [vmem:[#allocation5 + $0x588] ss:$16 sps:$4 sm:$0xff]  }
  0xc5   :  { %1378 = vmatpush1.bf16.msra.mxu0 %v3647_v3  ;;  %1550 = vmatpush1.bf16.msra.mxu1 %v3650_v4  ;;  %v3739_v3 = vld [vmem:[#allocation5 + $0x5a4] ss:$16 sps:$4 sm:$0xff]   ;;  %v3742_v4 = vld [vmem:[#allocation5 + $0x5ac] ss:$16 sps:$4 sm:$0xff]  }
  0xc6   :  { %1379 = vmatprep.subr.bf16.mxu0 %v3655_v5  ;;  %1551 = vmatprep.subr.bf16.mxu1 %v3658_v6  ;;  %v3737_v5 = vld [vmem:[#allocation5 + $0x5a0] ss:$16 sps:$4 sm:$0xff]   ;;  %v3740_v6 = vld [vmem:[#allocation5 + $0x5a8] ss:$16 sps:$4 sm:$0xff]  }
  0xc9   :  { %1380 = vmatpush1.bf16.msra.mxu0 %v3653_v7  ;;  %1552 = vmatpush1.bf16.msra.mxu1 %v3656_v8  ;;  %v3745_v7 = vld [vmem:[#allocation5 + $0x5c4] ss:$16 sps:$4 sm:$0xff]   ;;  %v3748_v8 = vld [vmem:[#allocation5 + $0x5cc] ss:$16 sps:$4 sm:$0xff]  }
  0xca   :  { %1392 = vmatprep.subr.bf16.mxu0 %v3661_v9  ;;  %1564 = vmatprep.subr.bf16.mxu1 %v3664_v12  ;;  %v3743_v9 = vld [vmem:[#allocation5 + $0x5c0] ss:$16 sps:$4 sm:$0xff]   ;;  %v3754_v12 = vld [vmem:[#allocation5 + $0x5ec] ss:$16 sps:$4 sm:$0xff]  }
  0xcc   :  { %1382 = vmatmul.mubr.bf16.vlgmr.msra.gmra.mrb[0].mxu0 %v99_v15  ;;  %1554 = vmatmul.mubr.bf16.vlgmr.msra.gmra.mrb[0].mxu1 %v99_v15  ;;  %v87_v15 = vld [vmem:[#allocation2 + $0x20] sm:$0xff] }
  0xcd   :  { %1393 = vmatpush1.bf16.msra.mxu0 %v3659_v13  ;;  %1565 = vmatpush1.bf16.msra.mxu1 %v3662_v14  ;;  %v3749_v13 = vld [vmem:[#allocation5 + $0x5e0] ss:$16 sps:$4 sm:$0xff]   ;;  %v3752_v14 = vld [vmem:[#allocation5 + $0x5e8] ss:$16 sps:$4 sm:$0xff]  }
  0xce   :  { %1394 = vmatprep.subr.bf16.mxu0 %v3667_v16  ;;  %1566 = vmatprep.subr.bf16.mxu1 %v3670_v17  ;;  %v94_v16 = vld [vmem:[#allocation2 + $0x58] sm:$0xff]  ;;  %v3757_v17 = vld [vmem:[#allocation5 + $0x604] ss:$16 sps:$4 sm:$0xff]  }
  0xcf   :  { %1424 = vmatprep.mubr.bf16.mxu0 %v102_v23  ;;  %1596 = vmatprep.mubr.bf16.mxu1 %v102_v23  ;;  %v101_v21 = vpack.c.bf16 %v94_v16, %v87_v15  ;;  %v3766_v23 = vld [vmem:[#allocation7 + $0xc] ss:$16 sps:$4 sm:$0xff]   ;;  %v3839_v16 = vld [vmem:[#allocation7 + $0x1a0] ss:$16 sps:$4 sm:$0xff]  }
  0xd0   :  { %v3844_v15 = vld [vmem:[#allocation7 + $0x1ac] ss:$16 sps:$4 sm:$0xff]  }
  0xd1   :  { %1395 = vmatpush1.bf16.msra.mxu0 %v3665_v19  ;;  %1567 = vmatpush1.bf16.msra.mxu1 %v3668_v20  ;;  %v3755_v19 = vld [vmem:[#allocation5 + $0x600] ss:$16 sps:$4 sm:$0xff]   ;;  %v3758_v20 = vld [vmem:[#allocation5 + $0x608] ss:$16 sps:$4 sm:$0xff]  }
  0xd2   :  { %1396 = vmatprep.subr.bf16.mxu0 %v3673_v22  ;;  %1568 = vmatprep.subr.bf16.mxu1 %v3676_v24  ;;  %v3763_v22 = vld [vmem:[#allocation7 + $0x4] ss:$16 sps:$4 sm:$0xff]   ;;  %v4113_v24 = vmov 0  }
  0xd5   :  { %1397 = vmatpush1.bf16.msra.mxu0 %v3671_v25  ;;  %1569 = vmatpush1.bf16.msra.mxu1 %v3674_v26  ;;  %v89_v25 = vld [vmem:[#allocation2 + $0x30] sm:$0xff]  ;;  %v96_v26 = vld [vmem:[#allocation2 + $0x68] sm:$0xff] }
  0xd6   :  { %1398 = vmatprep.subr.bf16.mxu0 %v3679_v27  ;;  %1570 = vmatprep.subr.bf16.mxu1 %v3682_v28  ;;  %v3761_v27 = vld [vmem:[#allocation7] ss:$16 sps:$4 sm:$0xff]   ;;  %v3764_v28 = vld [vmem:[#allocation7 + $0x8] ss:$16 sps:$4 sm:$0xff]  }
  0xd9   :  { %1399 = vmatpush1.bf16.msra.mxu0 %v3677_v29  ;;  %1571 = vmatpush1.bf16.msra.mxu1 %v3680_v30  ;;  %v103_v29 = vpack.c.bf16 %v96_v26, %v89_v25  ;;  %v3769_v30 = vld [vmem:[#allocation7 + $0x24] ss:$16 sps:$4 sm:$0xff]   ;;  %v3854_v25 = vld [vmem:[#allocation7 + $0x1e8] ss:$16 sps:$4 sm:$0xff]  }
  0xda   :  { %1400 = vmatprep.subr.bf16.mxu0 %v3685_v31  ;;  %1572 = vmatprep.subr.bf16.mxu1 %v3688_v32  ;;  %v3772_v31 = vld [vmem:[#allocation7 + $0x2c] ss:$16 sps:$4 sm:$0xff]   ;;  %v3767_v32 = vld [vmem:[#allocation7 + $0x20] ss:$16 sps:$4 sm:$0xff]   ;;  %v3859_v26 = vld [vmem:[#allocation7 + $0x204] ss:$16 sps:$4 sm:$0xff]  }
  0xdd   :  { %1401 = vmatpush1.bf16.msra.mxu0 %v3683_v33  ;;  %1573 = vmatpush1.bf16.msra.mxu1 %v3686_v34  ;;  %v3770_v33 = vld [vmem:[#allocation7 + $0x28] ss:$16 sps:$4 sm:$0xff]   ;;  %v3775_v34 = vld [vmem:[#allocation7 + $0x44] ss:$16 sps:$4 sm:$0xff]  }
  0xde   :  { %1402 = vmatprep.subr.bf16.mxu0 %v3691_v35  ;;  %1574 = vmatprep.subr.bf16.mxu1 %v3694_v36  ;;  %v3778_v35 = vld [vmem:[#allocation7 + $0x4c] ss:$16 sps:$4 sm:$0xff]   ;;  %v3773_v36 = vld [vmem:[#allocation7 + $0x40] ss:$16 sps:$4 sm:$0xff]  }
  0xe1   :  { %1403 = vmatpush1.bf16.msra.mxu0 %v3689_v37  ;;  %1575 = vmatpush1.bf16.msra.mxu1 %v3692_v38  ;;  %v3776_v37 = vld [vmem:[#allocation7 + $0x48] ss:$16 sps:$4 sm:$0xff]   ;;  %v3781_v38 = vld [vmem:[#allocation7 + $0x64] ss:$16 sps:$4 sm:$0xff]  }
  0xe2   :  { %1404 = vmatprep.subr.bf16.mxu0 %v3697_v39  ;;  %1576 = vmatprep.subr.bf16.mxu1 %v3700_v40  ;;  %v3784_v39 = vld [vmem:[#allocation7 + $0x6c] ss:$16 sps:$4 sm:$0xff]   ;;  %v3779_v40 = vld [vmem:[#allocation7 + $0x60] ss:$16 sps:$4 sm:$0xff]  }
  0xe5   :  { %1405 = vmatpush1.bf16.msra.mxu0 %v3695_v41  ;;  %1577 = vmatpush1.bf16.msra.mxu1 %v3698_v42  ;;  %v3782_v41 = vld [vmem:[#allocation7 + $0x68] ss:$16 sps:$4 sm:$0xff]   ;;  %v3787_v42 = vld [vmem:[#allocation7 + $0x84] ss:$16 sps:$4 sm:$0xff]  }
  0xe6   :  { %1406 = vmatprep.subr.bf16.mxu0 %v3703_v43  ;;  %1578 = vmatprep.subr.bf16.mxu1 %v3706_v44  ;;  %v3790_v43 = vld [vmem:[#allocation7 + $0x8c] ss:$16 sps:$4 sm:$0xff]   ;;  %v3785_v44 = vld [vmem:[#allocation7 + $0x80] ss:$16 sps:$4 sm:$0xff]  }
  0xe9   :  { %1407 = vmatpush1.bf16.msra.mxu0 %v3701_v45  ;;  %1579 = vmatpush1.bf16.msra.mxu1 %v3704_v46  ;;  %v3788_v45 = vld [vmem:[#allocation7 + $0x88] ss:$16 sps:$4 sm:$0xff]   ;;  %v3793_v46 = vld [vmem:[#allocation7 + $0xa4] ss:$16 sps:$4 sm:$0xff]  }
  0xea   :  { %1408 = vmatprep.subr.bf16.mxu0 %v3709_v47  ;;  %1580 = vmatprep.subr.bf16.mxu1 %v3712_v48  ;;  %v3796_v47 = vld [vmem:[#allocation7 + $0xac] ss:$16 sps:$4 sm:$0xff]   ;;  %v3791_v48 = vld [vmem:[#allocation7 + $0xa0] ss:$16 sps:$4 sm:$0xff]  }
  0xed   :  { %1409 = vmatpush1.bf16.msra.mxu0 %v3707_v49  ;;  %1581 = vmatpush1.bf16.msra.mxu1 %v3710_v50  ;;  %v3794_v49 = vld [vmem:[#allocation7 + $0xa8] ss:$16 sps:$4 sm:$0xff]   ;;  %v3799_v50 = vld [vmem:[#allocation7 + $0xc4] ss:$16 sps:$4 sm:$0xff]  }
  0xee   :  { %1410 = vmatprep.subr.bf16.mxu0 %v3715_v51  ;;  %1582 = vmatprep.subr.bf16.mxu1 %v3718_v52  ;;  %v3802_v51 = vld [vmem:[#allocation7 + $0xcc] ss:$16 sps:$4 sm:$0xff]   ;;  %v3797_v52 = vld [vmem:[#allocation7 + $0xc0] ss:$16 sps:$4 sm:$0xff]  }
  0xf1   :  { %1411 = vmatpush1.bf16.msra.mxu0 %v3713_v53  ;;  %1583 = vmatpush1.bf16.msra.mxu1 %v3716_v54  ;;  %v3800_v53 = vld [vmem:[#allocation7 + $0xc8] ss:$16 sps:$4 sm:$0xff]   ;;  %v3805_v54 = vld [vmem:[#allocation7 + $0xe4] ss:$16 sps:$4 sm:$0xff]  }
  0xf2   :  { %1412 = vmatprep.subr.bf16.mxu0 %v3721_v55  ;;  %1584 = vmatprep.subr.bf16.mxu1 %v3724_v56  ;;  %v3808_v55 = vld [vmem:[#allocation7 + $0xec] ss:$16 sps:$4 sm:$0xff]   ;;  %v3803_v56 = vld [vmem:[#allocation7 + $0xe0] ss:$16 sps:$4 sm:$0xff]  }
  0xf5   :  { %1413 = vmatpush1.bf16.msra.mxu0 %v3719_v57  ;;  %1585 = vmatpush1.bf16.msra.mxu1 %v3722_v58  ;;  %v3806_v57 = vld [vmem:[#allocation7 + $0xe8] ss:$16 sps:$4 sm:$0xff]   ;;  %v3811_v58 = vld [vmem:[#allocation7 + $0x104] ss:$16 sps:$4 sm:$0xff]  }
  0xf6   :  { %1414 = vmatprep.subr.bf16.mxu0 %v3727_v59  ;;  %1586 = vmatprep.subr.bf16.mxu1 %v3730_v60  ;;  %v3814_v59 = vld [vmem:[#allocation7 + $0x10c] ss:$16 sps:$4 sm:$0xff]   ;;  %v3809_v60 = vld [vmem:[#allocation7 + $0x100] ss:$16 sps:$4 sm:$0xff]  }
  0xf9   :  { %1415 = vmatpush1.bf16.msra.mxu0 %v3725_v61  ;;  %1587 = vmatpush1.bf16.msra.mxu1 %v3728_v62  ;;  %v3812_v61 = vld [vmem:[#allocation7 + $0x108] ss:$16 sps:$4 sm:$0xff]   ;;  %v3817_v62 = vld [vmem:[#allocation7 + $0x124] ss:$16 sps:$4 sm:$0xff]  }
  0xfa   :  { %1416 = vmatprep.subr.bf16.mxu0 %v3733_v63  ;;  %1588 = vmatprep.subr.bf16.mxu1 %v3736_v0  ;;  %v3820_v63 = vld [vmem:[#allocation7 + $0x12c] ss:$16 sps:$4 sm:$0xff]   ;;  %v3815_v0 = vld [vmem:[#allocation7 + $0x120] ss:$16 sps:$4 sm:$0xff]  }
  0xfd   :  { %1417 = vmatpush1.bf16.msra.mxu0 %v3731_v1  ;;  %1589 = vmatpush1.bf16.msra.mxu1 %v3734_v2  ;;  %v3818_v1 = vld [vmem:[#allocation7 + $0x128] ss:$16 sps:$4 sm:$0xff]   ;;  %v3823_v2 = vld [vmem:[#allocation7 + $0x144] ss:$16 sps:$4 sm:$0xff]  }
  0xfe   :  { %1418 = vmatprep.subr.bf16.mxu0 %v3739_v3  ;;  %1590 = vmatprep.subr.bf16.mxu1 %v3742_v4  ;;  %v3826_v3 = vld [vmem:[#allocation7 + $0x14c] ss:$16 sps:$4 sm:$0xff]   ;;  %v3821_v4 = vld [vmem:[#allocation7 + $0x140] ss:$16 sps:$4 sm:$0xff]  }
 0x101   :  { %1419 = vmatpush1.bf16.msra.mxu0 %v3737_v5  ;;  %1591 = vmatpush1.bf16.msra.mxu1 %v3740_v6  ;;  %v3824_v5 = vld [vmem:[#allocation7 + $0x148] ss:$16 sps:$4 sm:$0xff]   ;;  %v3829_v6 = vld [vmem:[#allocation7 + $0x164] ss:$16 sps:$4 sm:$0xff]  }
 0x102   :  { %1420 = vmatprep.subr.bf16.mxu0 %v3745_v7  ;;  %1592 = vmatprep.subr.bf16.mxu1 %v3748_v8  ;;  %v3832_v7 = vld [vmem:[#allocation7 + $0x16c] ss:$16 sps:$4 sm:$0xff]   ;;  %v3827_v8 = vld [vmem:[#allocation7 + $0x160] ss:$16 sps:$4 sm:$0xff]  }
 0x105   :  { %1421 = vmatpush1.bf16.msra.mxu0 %v3743_v9  ;;  %1593 = vmatpush1.bf16.msra.mxu1 %v3746_v10  ;;  %v3830_v9 = vld [vmem:[#allocation7 + $0x168] ss:$16 sps:$4 sm:$0xff]   ;;  %v3835_v10 = vld [vmem:[#allocation7 + $0x184] ss:$16 sps:$4 sm:$0xff]  }
 0x106   :  { %1422 = vmatprep.subr.bf16.mxu0 %v3751_v11  ;;  %1594 = vmatprep.subr.bf16.mxu1 %v3754_v12  ;;  %v3838_v11 = vld [vmem:[#allocation7 + $0x18c] ss:$16 sps:$4 sm:$0xff]   ;;  %v3833_v12 = vld [vmem:[#allocation7 + $0x180] ss:$16 sps:$4 sm:$0xff]  }
 0x109   :  { %1423 = vmatpush1.bf16.msra.mxu0 %v3749_v13  ;;  %1595 = vmatpush1.bf16.msra.mxu1 %v3752_v14  ;;  %v3836_v13 = vld [vmem:[#allocation7 + $0x188] ss:$16 sps:$4 sm:$0xff]   ;;  %v3841_v14 = vld [vmem:[#allocation7 + $0x1a4] ss:$16 sps:$4 sm:$0xff]  }
 0x10a   :  { %1435 = vmatprep.subr.bf16.mxu0 %v3757_v17  ;;  %1607 = vmatprep.subr.bf16.mxu1 %v3760_v18  ;;  %v3842_v17 = vld [vmem:[#allocation7 + $0x1a8] ss:$16 sps:$4 sm:$0xff]   ;;  %v3847_v18 = vld [vmem:[#allocation7 + $0x1c4] ss:$16 sps:$4 sm:$0xff]  }
 0x10c   :  { %1425 = vmatmul.mubr.bf16.vlgmr.msra.gmra.mrb[0].mxu0 %v101_v21  ;;  %1597 = vmatmul.mubr.bf16.vlgmr.msra.gmra.mrb[0].mxu1 %v101_v21  ;;  %v3848_v21 = vld [vmem:[#allocation7 + $0x1c8] ss:$16 sps:$4 sm:$0xff]  }
 0x10d   :  { %1436 = vmatpush1.bf16.msra.mxu0 %v3755_v19  ;;  %1608 = vmatpush1.bf16.msra.mxu1 %v3758_v20  ;;  %v3850_v19 = vld [vmem:[#allocation7 + $0x1cc] ss:$16 sps:$4 sm:$0xff]   ;;  %v3845_v20 = vld [vmem:[#allocation7 + $0x1c0] ss:$16 sps:$4 sm:$0xff]  }
 0x10e   :  { %1467 = vmatprep.mubr.bf16.mxu0 %v4113_v24  ;;  %1639 = vmatprep.mubr.bf16.mxu1 %v4113_v24  ;;  %v3851_v24 = vld [vmem:[#allocation7 + $0x1e0] ss:$16 sps:$4 sm:$0xff]  }
 0x10f   :  { %2452 = vmatprep.subr.bf16.mxu0 %v3763_v22  ;;  %2538 = vmatprep.subr.bf16.mxu1 %v3766_v23  ;;  %v3853_v22 = vld [vmem:[#allocation7 + $0x1e4] ss:$16 sps:$4 sm:$0xff]   ;;  %v3856_v23 = vld [vmem:[#allocation7 + $0x1ec] ss:$16 sps:$4 sm:$0xff]  }
 0x118   :  { %3198 = vmatmul.mubr.msk.bf16.vlgmr.msra.gmra.mrb[0].mxu0 %vm1302_vm0, %v103_v29  ;;  %3199 = vmatmul.mubr.msk.bf16.vlgmr.msra.gmra.mrb[0].mxu1 %vm1302_vm0, %v103_v29 }
 0x119   :  { %2453 = vmatpush1.bf16.msra.mxu0 %v3761_v27  ;;  %2539 = vmatpush1.bf16.msra.mxu1 %v3764_v28  ;;  %v3862_v27 = vld [vmem:[#allocation7 + $0x20c] ss:$16 sps:$4 sm:$0xff]   ;;  %v302_v28 = vlaneseq }
 0x11a   :  { %2454 = vmatprep.subr.bf16.mxu0 %v3769_v30  ;;  %2540 = vmatprep.subr.bf16.mxu1 %v3772_v31 }
 0x11b   :  { %v4220_v29 = vshrl.u32 %v302_v28, 7  ;;  %v3896_v28 = vld [vmem:[#allocation7 + $0x2c8] ss:$16 sps:$4 sm:$0xff]  }
 0x11d   :  { %2455 = vmatpush1.bf16.msra.mxu0 %v3767_v32  ;;  %2541 = vmatpush1.bf16.msra.mxu1 %v3770_v33  ;;  %v304_v30 = vsub.s32 0, %v4220_v29  ;;  %v312_v31 = vsub.s32 2, %v4220_v29  ;;  %v300_v32 = vld [vmem:[%s4269_s2] sm:$0xf]  ;;  %v308_v33 = vsub.s32 1, %v4220_v29 }
 0x11e   :  { %2456 = vmatprep.subr.bf16.mxu0 %v3775_v34  ;;  %2542 = vmatprep.subr.bf16.mxu1 %v3778_v35  ;;  %v316_v34 = vsub.s32 3, %v4220_v29 }
 0x11f   :  { %v305_v35 = vrot.slane %v300_v32, %v304_v30 }
 0x121   :  { %2457 = vmatpush1.bf16.msra.mxu0 %v3773_v36  ;;  %2543 = vmatpush1.bf16.msra.mxu1 %v3776_v37  ;;  %v313_v36 = vrot.slane %v300_v32, %v312_v31  ;;  %v309_v37 = vrot.slane %v300_v32, %v308_v33 }
 0x122   :  { %2458 = vmatprep.subr.bf16.mxu0 %v3781_v38  ;;  %2544 = vmatprep.subr.bf16.mxu1 %v3784_v39  ;;  %v317_v38 = vrot.slane %v300_v32, %v316_v34  ;;  %v3901_v32 = vld [vmem:[#allocation7 + $0x2e4] ss:$16 sps:$4 sm:$0xff]  }
 0x125   :  { %2459 = vmatpush1.bf16.msra.mxu0 %v3779_v40  ;;  %2545 = vmatpush1.bf16.msra.mxu1 %v3782_v41 }
 0x126   :  { %2460 = vmatprep.subr.bf16.mxu0 %v3787_v42  ;;  %2546 = vmatprep.subr.bf16.mxu1 %v3790_v43 }
 0x129   :  { %2461 = vmatpush1.bf16.msra.mxu0 %v3785_v44  ;;  %2547 = vmatpush1.bf16.msra.mxu1 %v3788_v45 }
 0x12a   :  { %2462 = vmatprep.subr.bf16.mxu0 %v3793_v46  ;;  %2548 = vmatprep.subr.bf16.mxu1 %v3796_v47 }
 0x12d   :  { %2463 = vmatpush1.bf16.msra.mxu0 %v3791_v48  ;;  %2549 = vmatpush1.bf16.msra.mxu1 %v3794_v49 }
 0x12e   :  { %2464 = vmatprep.subr.bf16.mxu0 %v3799_v50  ;;  %2550 = vmatprep.subr.bf16.mxu1 %v3802_v51 }
 0x131   :  { %2465 = vmatpush1.bf16.msra.mxu0 %v3797_v52  ;;  %2551 = vmatpush1.bf16.msra.mxu1 %v3800_v53 }
 0x132   :  { %2466 = vmatprep.subr.bf16.mxu0 %v3805_v54  ;;  %2552 = vmatprep.subr.bf16.mxu1 %v3808_v55 }
 0x135   :  { %2467 = vmatpush1.bf16.msra.mxu0 %v3803_v56  ;;  %2553 = vmatpush1.bf16.msra.mxu1 %v3806_v57 }
 0x136   :  { %2468 = vmatprep.subr.bf16.mxu0 %v3811_v58  ;;  %2554 = vmatprep.subr.bf16.mxu1 %v3814_v59 }
 0x139   :  { %2469 = vmatpush1.bf16.msra.mxu0 %v3809_v60  ;;  %2555 = vmatpush1.bf16.msra.mxu1 %v3812_v61 }
 0x13a   :  { %2470 = vmatprep.subr.bf16.mxu0 %v3817_v62  ;;  %2556 = vmatprep.subr.bf16.mxu1 %v3820_v63 }
 0x13d   :  { %2471 = vmatpush1.bf16.msra.mxu0 %v3815_v0  ;;  %2557 = vmatpush1.bf16.msra.mxu1 %v3818_v1 }
 0x13e   :  { %2472 = vmatprep.subr.bf16.mxu0 %v3823_v2  ;;  %2558 = vmatprep.subr.bf16.mxu1 %v3826_v3  ;;  %v3857_v3 = vld [vmem:[#allocation7 + $0x200] ss:$16 sps:$4 sm:$0xff]  }
 0x141   :  { %2473 = vmatpush1.bf16.msra.mxu0 %v3821_v4  ;;  %2559 = vmatpush1.bf16.msra.mxu1 %v3824_v5  ;;  %v3860_v4 = vld [vmem:[#allocation7 + $0x208] ss:$16 sps:$4 sm:$0xff]   ;;  %v3865_v5 = vld [vmem:[#allocation7 + $0x224] ss:$16 sps:$4 sm:$0xff]  }
 0x142   :  { %2474 = vmatprep.subr.bf16.mxu0 %v3829_v6  ;;  %2560 = vmatprep.subr.bf16.mxu1 %v3832_v7  ;;  %v3868_v6 = vld [vmem:[#allocation7 + $0x22c] ss:$16 sps:$4 sm:$0xff]   ;;  %v3863_v7 = vld [vmem:[#allocation7 + $0x220] ss:$16 sps:$4 sm:$0xff]  }
 0x145   :  { %2475 = vmatpush1.bf16.msra.mxu0 %v3827_v8  ;;  %2561 = vmatpush1.bf16.msra.mxu1 %v3830_v9  ;;  %v3866_v8 = vld [vmem:[#allocation7 + $0x228] ss:$16 sps:$4 sm:$0xff]   ;;  %v3871_v9 = vld [vmem:[#allocation7 + $0x244] ss:$16 sps:$4 sm:$0xff]  }
 0x146   :  { %2476 = vmatprep.subr.bf16.mxu0 %v3835_v10  ;;  %2562 = vmatprep.subr.bf16.mxu1 %v3838_v11  ;;  %v3874_v10 = vld [vmem:[#allocation7 + $0x24c] ss:$16 sps:$4 sm:$0xff]   ;;  %v3869_v11 = vld [vmem:[#allocation7 + $0x240] ss:$16 sps:$4 sm:$0xff]  }
 0x149   :  { %2477 = vmatpush1.bf16.msra.mxu0 %v3833_v12  ;;  %2563 = vmatpush1.bf16.msra.mxu1 %v3836_v13  ;;  %v3872_v12 = vld [vmem:[#allocation7 + $0x248] ss:$16 sps:$4 sm:$0xff]   ;;  %v3877_v13 = vld [vmem:[#allocation7 + $0x264] ss:$16 sps:$4 sm:$0xff]  }
 0x14a   :  { %2478 = vmatprep.subr.bf16.mxu0 %v3841_v14  ;;  %2564 = vmatprep.subr.bf16.mxu1 %v3844_v15  ;;  %v3880_v14 = vld [vmem:[#allocation7 + $0x26c] ss:$16 sps:$4 sm:$0xff]   ;;  %v3875_v15 = vld [vmem:[#allocation7 + $0x260] ss:$16 sps:$4 sm:$0xff]  }
 0x14d   :  { %2479 = vmatpush1.bf16.msra.mxu0 %v3839_v16  ;;  %2565 = vmatpush1.bf16.msra.mxu1 %v3842_v17  ;;  %v3878_v16 = vld [vmem:[#allocation7 + $0x268] ss:$16 sps:$4 sm:$0xff]   ;;  %v3883_v17 = vld [vmem:[#allocation7 + $0x284] ss:$16 sps:$4 sm:$0xff]  }
 0x14e   :  { %2480 = vmatprep.subr.bf16.mxu0 %v3847_v18  ;;  %2566 = vmatprep.subr.bf16.mxu1 %v3850_v19  ;;  %v3886_v18 = vld [vmem:[#allocation7 + $0x28c] ss:$16 sps:$4 sm:$0xff]   ;;  %v3881_v19 = vld [vmem:[#allocation7 + $0x280] ss:$16 sps:$4 sm:$0xff]  }
 0x151   :  { %2481 = vmatpush1.bf16.msra.mxu0 %v3845_v20  ;;  %2567 = vmatpush1.bf16.msra.mxu1 %v3848_v21  ;;  %v3884_v20 = vld [vmem:[#allocation7 + $0x288] ss:$16 sps:$4 sm:$0xff]   ;;  %v3889_v21 = vld [vmem:[#allocation7 + $0x2a4] ss:$16 sps:$4 sm:$0xff]  }
 0x152   :  { %2482 = vmatprep.subr.bf16.mxu0 %v3853_v22  ;;  %2568 = vmatprep.subr.bf16.mxu1 %v3856_v23  ;;  %v3892_v22 = vld [vmem:[#allocation7 + $0x2ac] ss:$16 sps:$4 sm:$0xff]   ;;  %v3887_v23 = vld [vmem:[#allocation7 + $0x2a0] ss:$16 sps:$4 sm:$0xff]  }
 0x155   :  { %2483 = vmatpush1.bf16.msra.mxu0 %v3851_v24  ;;  %2569 = vmatpush1.bf16.msra.mxu1 %v3854_v25  ;;  %v3890_v24 = vld [vmem:[#allocation7 + $0x2a8] ss:$16 sps:$4 sm:$0xff]   ;;  %v3895_v25 = vld [vmem:[#allocation7 + $0x2c4] ss:$16 sps:$4 sm:$0xff]  }
 0x156   :  { %2495 = vmatprep.subr.bf16.mxu0 %v3859_v26  ;;  %2581 = vmatprep.subr.bf16.mxu1 %v3862_v27  ;;  %v3898_v26 = vld [vmem:[#allocation7 + $0x2cc] ss:$16 sps:$4 sm:$0xff]   ;;  %v3893_v27 = vld [vmem:[#allocation7 + $0x2c0] ss:$16 sps:$4 sm:$0xff]  }
 0x1eb   :  { %v1469_v39 = vpop.f32.mrb[0].mxu0  ;;  %v1641_v40 = vpop.f32.mrb[0].mxu1 }
 0x1ec   :  { %v3405_v41 = vadd.f32 %v1469_v39, %v305_v35  ;;  %v3409_v42 = vadd.f32 %v1641_v40, %v313_v36  ;;  %v1471_v43 = vpop.f32.mrb[1].mxu0  ;;  %v1643_v44 = vpop.f32.mrb[1].mxu1  ;;  %v3910_v39 = vld [vmem:[#allocation7 + $0x30c] ss:$16 sps:$4 sm:$0xff]   ;;  %v3905_v40 = vld [vmem:[#allocation7 + $0x300] ss:$16 sps:$4 sm:$0xff]  }
 0x1ed   :  { %v3406_v45 = vadd.f32 %v1471_v43, %v309_v37  ;;  %v3410_v46 = vadd.f32 %v1643_v44, %v317_v38  ;;  %v1473_v47 = vpop.f32.mrb[2].mxu0  ;;  %v1645_v48 = vpop.f32.mrb[2].mxu1  ;;  %v3916_v43 = vld [vmem:[#allocation7 + $0x32c] ss:$16 sps:$4 sm:$0xff]   ;;  %v3911_v44 = vld [vmem:[#allocation7 + $0x320] ss:$16 sps:$4 sm:$0xff]  }
 0x1ee   :  { %v3407_v49 = vadd.f32 %v1473_v47, %v305_v35  ;;  %v3411_v50 = vadd.f32 %v1645_v48, %v313_v36  ;;  %v1475_v51 = vpop.f32.mrb[3].mxu0  ;;  %v1647_v52 = vpop.f32.mrb[3].mxu1  ;;  %v1650_v55 = vmax.f32 %v3405_v41, 0.0  ;;  %v1652_v56 = vmax.f32 %v3409_v42, 0.0  ;;  %v3904_v35 = vld [vmem:[#allocation7 + $0x2ec] ss:$16 sps:$4 sm:$0xff]  }
 0x1ef   :  { %v3408_v53 = vadd.f32 %v1475_v51, %v309_v37  ;;  %v3412_v54 = vadd.f32 %v1647_v52, %v317_v38  ;;  %v1651_v59 = vmax.f32 %v3406_v45, 0.0  ;;  %v1653_v60 = vmax.f32 %v3410_v46, 0.0  ;;  %v3899_v36 = vld [vmem:[#allocation7 + $0x2e0] ss:$16 sps:$4 sm:$0xff]   ;;  %v3902_v37 = vld [vmem:[#allocation7 + $0x2e8] ss:$16 sps:$4 sm:$0xff]  }
 0x1f0   :  { %v1654_v57 = vmax.f32 %v3407_v49, 0.0  ;;  %v1656_v58 = vmax.f32 %v3411_v50, 0.0  ;;  %v3907_v38 = vld [vmem:[#allocation7 + $0x304] ss:$16 sps:$4 sm:$0xff]   ;;  %v3908_v41 = vld [vmem:[#allocation7 + $0x308] ss:$16 sps:$4 sm:$0xff]  }
 0x1f1   :  { %v1655_v61 = vmax.f32 %v3408_v53, 0.0  ;;  %v1657_v62 = vmax.f32 %v3412_v54, 0.0  ;;  %v3913_v42 = vld [vmem:[#allocation7 + $0x324] ss:$16 sps:$4 sm:$0xff]   ;;  %v3914_v45 = vld [vmem:[#allocation7 + $0x328] ss:$16 sps:$4 sm:$0xff]  }
 0x1f2   :  { %v1658_v63 = vpack.c.bf16 %v1654_v57, %v1650_v55  ;;  %v4237_v0 = vpack.c.bf16 %v1656_v58, %v1652_v56  ;;  %v3919_v46 = vld [vmem:[#allocation7 + $0x344] ss:$16 sps:$4 sm:$0xff]   ;;  %v3922_v47 = vld [vmem:[#allocation7 + $0x34c] ss:$16 sps:$4 sm:$0xff]   ;;  %v3917_v48 = vld [vmem:[#allocation7 + $0x340] ss:$16 sps:$4 sm:$0xff]  }
 0x1f3   :  { %v1659_v1 = vpack.c.bf16 %v1655_v61, %v1651_v59  ;;  %v1661_v2 = vpack.c.bf16 %v1657_v62, %v1653_v60  ;;  %v3920_v49 = vld [vmem:[#allocation7 + $0x348] ss:$16 sps:$4 sm:$0xff]   ;;  %v3925_v50 = vld [vmem:[#allocation7 + $0x364] ss:$16 sps:$4 sm:$0xff]   ;;  %v3928_v51 = vld [vmem:[#allocation7 + $0x36c] ss:$16 sps:$4 sm:$0xff]  }
 0x1f4   :  { %v3923_v52 = vld [vmem:[#allocation7 + $0x360] ss:$16 sps:$4 sm:$0xff]   ;;  %v3926_v53 = vld [vmem:[#allocation7 + $0x368] ss:$16 sps:$4 sm:$0xff]   ;;  %v3931_v54 = vld [vmem:[#allocation7 + $0x384] ss:$16 sps:$4 sm:$0xff]  }
 0x1f5   :  { %2484 = vmatprep.mubr.bf16.mxu0 %v1659_v1  ;;  %2570 = vmatprep.mubr.bf16.mxu1 %v1659_v1  ;;  %v3934_v55 = vld [vmem:[#allocation7 + $0x38c] ss:$16 sps:$4 sm:$0xff]   ;;  %v3929_v56 = vld [vmem:[#allocation7 + $0x380] ss:$16 sps:$4 sm:$0xff]   ;;  %v3932_v57 = vld [vmem:[#allocation7 + $0x388] ss:$16 sps:$4 sm:$0xff]  }
 0x1f6   :  { %2485 = vmatmul.mubr.bf16.vlgmr.msra.gmra.mrb[4].mxu0 %v1658_v63  ;;  %2571 = vmatmul.mubr.bf16.vlgmr.msra.gmra.mrb[4].mxu1 %v1658_v63  ;;  %v3937_v58 = vld [vmem:[#allocation7 + $0x3a4] ss:$16 sps:$4 sm:$0xff]   ;;  %v3940_v59 = vld [vmem:[#allocation7 + $0x3ac] ss:$16 sps:$4 sm:$0xff]   ;;  %v3935_v60 = vld [vmem:[#allocation7 + $0x3a0] ss:$16 sps:$4 sm:$0xff]  }
 0x1f7   :  { %2496 = vmatpush1.bf16.msra.mxu0 %v3857_v3  ;;  %2582 = vmatpush1.bf16.msra.mxu1 %v3860_v4  ;;  %v3938_v61 = vld [vmem:[#allocation7 + $0x3a8] ss:$16 sps:$4 sm:$0xff]   ;;  %v3943_v62 = vld [vmem:[#allocation7 + $0x3c4] ss:$16 sps:$4 sm:$0xff]   ;;  %v3946_v63 = vld [vmem:[#allocation7 + $0x3cc] ss:$16 sps:$4 sm:$0xff]  }
 0x1f8   :  { %2527 = vmatprep.mubr.bf16.mxu0 %v1661_v2  ;;  %2613 = vmatprep.mubr.bf16.mxu1 %v1661_v2  ;;  %v3941_v1 = vld [vmem:[#allocation7 + $0x3c0] ss:$16 sps:$4 sm:$0xff]   ;;  %v3944_v2 = vld [vmem:[#allocation7 + $0x3c8] ss:$16 sps:$4 sm:$0xff]   ;;  %v3949_v3 = vld [vmem:[#allocation7 + $0x3e4] ss:$16 sps:$4 sm:$0xff]  }
 0x1f9   :  { %2497 = vmatprep.subr.bf16.mxu0 %v3865_v5  ;;  %2583 = vmatprep.subr.bf16.mxu1 %v3868_v6  ;;  %v3952_v4 = vld [vmem:[#allocation7 + $0x3ec] ss:$16 sps:$4 sm:$0xff]   ;;  %v3947_v5 = vld [vmem:[#allocation7 + $0x3e0] ss:$16 sps:$4 sm:$0xff]   ;;  %v3950_v6 = vld [vmem:[#allocation7 + $0x3e8] ss:$16 sps:$4 sm:$0xff]  }
 0x1fb   :  { %2498 = vmatpush1.bf16.msra.mxu0 %v3863_v7  ;;  %2584 = vmatpush1.bf16.msra.mxu1 %v3866_v8  ;;  %v3953_v7 = vld [vmem:[#allocation8 + $0x40] sm:$0xff]  }
 0x1fc   :  { %2499 = vmatprep.subr.bf16.mxu0 %v3871_v9  ;;  %2585 = vmatprep.subr.bf16.mxu1 %v3874_v10  ;;  %v3954_v8 = vld [vmem:[#allocation8 + $0xc0] sm:$0xff]  }
 0x1fd   :  { %v3955_v9 = vld [vmem:[#allocation8] sm:$0xff]  }
 0x1fe   :  { %v3956_v10 = vld [vmem:[#allocation8 + $0x80] sm:$0xff]  }
 0x1ff   :  { %2500 = vmatpush1.bf16.msra.mxu0 %v3869_v11  ;;  %2586 = vmatpush1.bf16.msra.mxu1 %v3872_v12  ;;  %v3957_v11 = vld [vmem:[#allocation8 + $0x48] sm:$0xff]  }
 0x200   :  { %2501 = vmatprep.subr.bf16.mxu0 %v3877_v13  ;;  %2587 = vmatprep.subr.bf16.mxu1 %v3880_v14  ;;  %v3958_v12 = vld [vmem:[#allocation8 + $0xc8] sm:$0xff]  }
 0x201   :  { %v3959_v13 = vld [vmem:[#allocation8 + $0x8] sm:$0xff]  }
 0x202   :  { %v3960_v14 = vld [vmem:[#allocation8 + $0x88] sm:$0xff]  }
 0x203   :  { %2502 = vmatpush1.bf16.msra.mxu0 %v3875_v15  ;;  %2588 = vmatpush1.bf16.msra.mxu1 %v3878_v16  ;;  %v3961_v15 = vld [vmem:[#allocation8 + $0x50] sm:$0xff]  }
 0x204   :  { %2503 = vmatprep.subr.bf16.mxu0 %v3883_v17  ;;  %2589 = vmatprep.subr.bf16.mxu1 %v3886_v18  ;;  %v3962_v16 = vld [vmem:[#allocation8 + $0xd0] sm:$0xff]  }
 0x205   :  { %v3963_v17 = vld [vmem:[#allocation8 + $0x10] sm:$0xff]  }
 0x206   :  { %v3964_v18 = vld [vmem:[#allocation8 + $0x90] sm:$0xff]  }
 0x207   :  { %2504 = vmatpush1.bf16.msra.mxu0 %v3881_v19  ;;  %2590 = vmatpush1.bf16.msra.mxu1 %v3884_v20  ;;  %v3965_v19 = vld [vmem:[#allocation8 + $0x58] sm:$0xff]  }
 0x208   :  { %2505 = vmatprep.subr.bf16.mxu0 %v3889_v21  ;;  %2591 = vmatprep.subr.bf16.mxu1 %v3892_v22  ;;  %v3966_v20 = vld [vmem:[#allocation8 + $0xd8] sm:$0xff]   ;;  %v3969_v22 = vld [vmem:[#allocation8 + $0x60] sm:$0xff]  }
 0x209   :  { %v3967_v21 = vld [vmem:[#allocation8 + $0x18] sm:$0xff]  }
 0x20b   :  { %2506 = vmatpush1.bf16.msra.mxu0 %v3887_v23  ;;  %2592 = vmatpush1.bf16.msra.mxu1 %v3890_v24  ;;  %v3970_v23 = vld [vmem:[#allocation8 + $0xe0] sm:$0xff]  }
 0x20c   :  { %2507 = vmatprep.subr.bf16.mxu0 %v3895_v25  ;;  %2593 = vmatprep.subr.bf16.mxu1 %v3898_v26  ;;  %v3971_v24 = vld [vmem:[#allocation8 + $0x20] sm:$0xff]   ;;  %v3973_v26 = vld [vmem:[#allocation8 + $0x68] sm:$0xff]  }
 0x20d   :  { %v3972_v25 = vld [vmem:[#allocation8 + $0xa0] sm:$0xff]  }
 0x20f   :  { %2508 = vmatpush1.bf16.msra.mxu0 %v3893_v27  ;;  %2594 = vmatpush1.bf16.msra.mxu1 %v3896_v28  ;;  %v3974_v27 = vld [vmem:[#allocation8 + $0xe8] sm:$0xff]  }
 0x210   :  { %2509 = vmatprep.subr.bf16.mxu0 %v3901_v32  ;;  %2595 = vmatprep.subr.bf16.mxu1 %v3904_v35  ;;  %v3975_v28 = vld [vmem:[#allocation8 + $0x28] sm:$0xff]   ;;  %v3977_v35 = vld [vmem:[#allocation8 + $0x70] sm:$0xff]  }
 0x211   :  { %v3976_v32 = vld [vmem:[#allocation8 + $0xa8] sm:$0xff]  }
 0x213   :  { %2510 = vmatpush1.bf16.msra.mxu0 %v3899_v36  ;;  %2596 = vmatpush1.bf16.msra.mxu1 %v3902_v37  ;;  %v3978_v36 = vld [vmem:[#allocation8 + $0xf0] sm:$0xff]  }
 0x214   :  { %2511 = vmatprep.subr.bf16.mxu0 %v3907_v38  ;;  %2597 = vmatprep.subr.bf16.mxu1 %v3910_v39  ;;  %v3979_v37 = vld [vmem:[#allocation8 + $0x30] sm:$0xff]   ;;  %v3981_v39 = vld [vmem:[#allocation8 + $0x78] sm:$0xff]  }
 0x215   :  { %v3980_v38 = vld [vmem:[#allocation8 + $0xb0] sm:$0xff]  }
 0x217   :  { %2512 = vmatpush1.bf16.msra.mxu0 %v3905_v40  ;;  %2598 = vmatpush1.bf16.msra.mxu1 %v3908_v41  ;;  %v3982_v40 = vld [vmem:[#allocation8 + $0xf8] sm:$0xff]  }
 0x218   :  { %2513 = vmatprep.subr.bf16.mxu0 %v3913_v42  ;;  %2599 = vmatprep.subr.bf16.mxu1 %v3916_v43  ;;  %v3983_v41 = vld [vmem:[#allocation8 + $0x38] sm:$0xff]   ;;  %v1790_v43 = vld [vmem:[%s4271_s4] sm:$0xf] }
 0x219   :  { %v3984_v42 = vld [vmem:[#allocation8 + $0xb8] sm:$0xff]  }
 0x21b   :  { %2514 = vmatpush1.bf16.msra.mxu0 %v3911_v44  ;;  %2600 = vmatpush1.bf16.msra.mxu1 %v3914_v45  ;;  %v1795_v44 = vrot.slane %v1790_v43, %v304_v30  ;;  %v1803_v45 = vrot.slane %v1790_v43, %v312_v31 }
 0x21c   :  { %2515 = vmatprep.subr.bf16.mxu0 %v3919_v46  ;;  %2601 = vmatprep.subr.bf16.mxu1 %v3922_v47  ;;  %v1799_v46 = vrot.slane %v1790_v43, %v308_v33  ;;  %v1807_v47 = vrot.slane %v1790_v43, %v316_v34 }
 0x21f   :  { %2516 = vmatpush1.bf16.msra.mxu0 %v3917_v48  ;;  %2602 = vmatpush1.bf16.msra.mxu1 %v3920_v49 }
 0x220   :  { %2517 = vmatprep.subr.bf16.mxu0 %v3925_v50  ;;  %2603 = vmatprep.subr.bf16.mxu1 %v3928_v51 }
 0x223   :  { %2518 = vmatpush1.bf16.msra.mxu0 %v3923_v52  ;;  %2604 = vmatpush1.bf16.msra.mxu1 %v3926_v53 }
 0x224   :  { %2519 = vmatprep.subr.bf16.mxu0 %v3931_v54  ;;  %2605 = vmatprep.subr.bf16.mxu1 %v3934_v55 }
 0x227   :  { %2520 = vmatpush1.bf16.msra.mxu0 %v3929_v56  ;;  %2606 = vmatpush1.bf16.msra.mxu1 %v3932_v57 }
 0x228   :  { %2521 = vmatprep.subr.bf16.mxu0 %v3937_v58  ;;  %2607 = vmatprep.subr.bf16.mxu1 %v3940_v59 }
 0x22b   :  { %2522 = vmatpush1.bf16.msra.mxu0 %v3935_v60  ;;  %2608 = vmatpush1.bf16.msra.mxu1 %v3938_v61 }
 0x22c   :  { %2523 = vmatprep.subr.bf16.mxu0 %v3943_v62  ;;  %2609 = vmatprep.subr.bf16.mxu1 %v3946_v63 }
 0x22f   :  { %2524 = vmatpush1.bf16.msra.mxu0 %v3941_v1  ;;  %2610 = vmatpush1.bf16.msra.mxu1 %v3944_v2 }
 0x230   :  { %2525 = vmatprep.subr.bf16.mxu0 %v3949_v3  ;;  %2611 = vmatprep.subr.bf16.mxu1 %v3952_v4 }
 0x233   :  { %2526 = vmatpush1.bf16.msra.mxu0 %v3947_v5  ;;  %2612 = vmatpush1.bf16.msra.mxu1 %v3950_v6 }
 0x234   :  { %3361 = vmatprep.subr.bf16.mxu0 %v3953_v7  ;;  %3383 = vmatprep.subr.bf16.mxu1 %v3954_v8 }
 0x236   :  { %2528 = vmatmul.mubr.bf16.vlgmr.msra.gmra.mrb[4].mxu0 %v4237_v0  ;;  %2614 = vmatmul.mubr.bf16.vlgmr.msra.gmra.mrb[4].mxu1 %v4237_v0  ;;  %v3968_v0 = vld [vmem:[#allocation8 + $0x98] sm:$0xff]  }
 0x237   :  { %3362 = vmatpush3.bf16.msra.mxu0 %v3955_v9  ;;  %3384 = vmatpush3.bf16.msra.mxu1 %v3956_v10  ;;  %v3328_v10 = vld [vmem:[%s4273_s6] ss:$0 sm:$0xff]  ;;  %s4073_s6 = scalar_lea.vmem %s2989_s9, 256 }
 0x238   :  { %3363 = vmatprep.subr.bf16.mxu0 %v3957_v11  ;;  %3385 = vmatprep.subr.bf16.mxu1 %v3958_v12  ;;  %p4074_p4 = scmp.ne.s32.totalorder %s2989_s9, %s4073_s6  ;;  %p4079_p6 = scmp.lt.s32.totalorder %s4073_s6, %s4073_s6 }
 0x23a   :  { %p4080_p7 = por %p4079_p6, %p4078_p5 }
 0x23b   :  { %3364 = vmatpush3.bf16.msra.mxu0 %v3959_v13  ;;  %3386 = vmatpush3.bf16.msra.mxu1 %v3960_v14 }
 0x23c   :  { %3365 = vmatprep.subr.bf16.mxu0 %v3961_v15  ;;  %3387 = vmatprep.subr.bf16.mxu1 %v3962_v16  ;;  %p4081_p8 = pnand %p4080_p7, %p4074_p4 }
 0x23f   :  { %3366 = vmatpush3.bf16.msra.mxu0 %v3963_v17  ;;  %3388 = vmatpush3.bf16.msra.mxu1 %v3964_v18 }
 0x240   :  { %3367 = vmatprep.subr.bf16.mxu0 %v3965_v19  ;;  %3389 = vmatprep.subr.bf16.mxu1 %v3966_v20 }
 0x243   :  { %3368 = vmatpush3.bf16.msra.mxu0 %v3967_v21  ;;  %3390 = vmatpush3.bf16.msra.mxu1 %v3968_v0 }
 0x244   :  { %3369 = vmatprep.subr.bf16.mxu0 %v3969_v22  ;;  %3391 = vmatprep.subr.bf16.mxu1 %v3970_v23 }
 0x247   :  { %3370 = vmatpush3.bf16.msra.mxu0 %v3971_v24  ;;  %3392 = vmatpush3.bf16.msra.mxu1 %v3972_v25 }
 0x248   :  { %3371 = vmatprep.subr.bf16.mxu0 %v3973_v26  ;;  %3393 = vmatprep.subr.bf16.mxu1 %v3974_v27 }
 0x24b   :  { %3372 = vmatpush3.bf16.msra.mxu0 %v3975_v28  ;;  %3394 = vmatpush3.bf16.msra.mxu1 %v3976_v32 }
 0x24c   :  { %3373 = vmatprep.subr.bf16.mxu0 %v3977_v35  ;;  %3395 = vmatprep.subr.bf16.mxu1 %v3978_v36 }
 0x24f   :  { %3374 = vmatpush3.bf16.msra.mxu0 %v3979_v37  ;;  %3396 = vmatpush3.bf16.msra.mxu1 %v3980_v38 }
 0x250   :  { %3375 = vmatprep.subr.bf16.mxu0 %v3981_v39  ;;  %3397 = vmatprep.subr.bf16.mxu1 %v3982_v40 }
 0x253   :  { %3376 = vmatpush3.bf16.msra.mxu0 %v3983_v41  ;;  %3398 = vmatpush3.bf16.msra.mxu1 %v3984_v42 }
 0x309   :  { %v2529_v48 = vpop.f32.mrb[4].mxu0  ;;  %v2615_v49 = vpop.f32.mrb[4].mxu1 }
 0x30a   :  { %v3413_v50 = vadd.f32 %v2529_v48, %v1795_v44  ;;  %v3417_v51 = vadd.f32 %v2615_v49, %v1803_v45  ;;  %v2531_v52 = vpop.f32.mrb[5].mxu0  ;;  %v2617_v53 = vpop.f32.mrb[5].mxu1 }
 0x30b   :  { %v3414_v54 = vadd.f32 %v2531_v52, %v1799_v46  ;;  %v3418_v55 = vadd.f32 %v2617_v53, %v1807_v47  ;;  %v2533_v56 = vpop.f32.mrb[6].mxu0  ;;  %v2619_v57 = vpop.f32.mrb[6].mxu1 }
 0x30c   :  { %v3415_v30 = vadd.f32 %v2533_v56, %v1795_v44  ;;  %v3419_v58 = vadd.f32 %v2619_v57, %v1803_v45  ;;  %v2535_v59 = vpop.f32.mrb[7].mxu0  ;;  %v2621_v31 = vpop.f32.mrb[7].mxu1  ;;  %v2624_v33 = vmax.f32 %v3413_v50, 0.0  ;;  %v2626_v62 = vmax.f32 %v3417_v51, 0.0 }
 0x30d   :  { %v3416_v60 = vadd.f32 %v2535_v59, %v1799_v46  ;;  %v3420_v61 = vadd.f32 %v2621_v31, %v1807_v47  ;;  %v2625_v63 = vmax.f32 %v3414_v54, 0.0  ;;  %v2627_v1 = vmax.f32 %v3418_v55, 0.0 }
 0x30e   :  { %v2628_v29 = vmax.f32 %v3415_v30, 0.0  ;;  %v2630_v34 = vmax.f32 %v3419_v58, 0.0 }
 0x30f   :  { %v2629_v2 = vmax.f32 %v3416_v60, 0.0  ;;  %v2631_v3 = vmax.f32 %v3420_v61, 0.0 }
 0x310   :  { %v2632_v4 = vpack.c.bf16 %v2628_v29, %v2624_v33  ;;  %v2634_v5 = vpack.c.bf16 %v2630_v34, %v2626_v62 }
 0x311   :  { %v2633_v6 = vpack.c.bf16 %v2629_v2, %v2625_v63  ;;  %v2635_v7 = vpack.c.bf16 %v2631_v3, %v2627_v1 }
 0x313   :  { %2931 = vmatprep.mubr.bf16.mxu0 %v2633_v6  ;;  %2972 = vmatprep.mubr.bf16.mxu1 %v2635_v7 }
 0x314   :  { %2932 = vmatmul.mubr.bf16.vlgmr.msra.gmra.mrb[8].mxu0 %v2632_v4  ;;  %2973 = vmatmul.mubr.bf16.vlgmr.msra.gmra.mrb[8].mxu1 %v2634_v5 }
 0x3e7   :  { %v3377_v8 = vpop.f32.mrb[8].mxu0  ;;  %v3399_v9 = vpop.f32.mrb[8].mxu1 }
 0x3e8   :  { %v3378_v11 = vpop.f32.mrb[9].mxu0  ;;  %v3400_v12 = vpop.f32.mrb[9].mxu1 }
 0x3e9   :  { %v3379_v13 = vadd.f32 %v3378_v11, %v3377_v8  ;;  %v3401_v14 = vadd.f32 %v3400_v12, %v3399_v9  ;;  %v3380_v15 = vpop.f32.mrb[10].mxu0  ;;  %v3402_v16 = vpop.f32.mrb[10].mxu1 }
 0x3ea   :  { %v3381_v17 = vpop.f32.mrb[11].mxu0  ;;  %v3403_v18 = vpop.f32.mrb[11].mxu1 }
 0x3eb   :  { %v2934_v19 = vadd.f32 %v3379_v13, %v3328_v10  ;;  %v3382_v20 = vadd.f32 %v3381_v17, %v3380_v15  ;;  %v3404_v21 = vadd.f32 %v3403_v18, %v3402_v16 }
 0x3ed   :  { %v2975_v0 = vadd.f32 %v3401_v14, %v2934_v19  ;;  %v2937_v22 = vadd.f32 %v3382_v20, %v3328_v10 }
 0x3ef   :  { %2981 = vst [vmem:[#allocation10] sm:$0xff] %v2975_v0  ;;  %v2978_v23 = vadd.f32 %v3404_v21, %v2937_v22 }
 0x3f1   :  { %2982 = vst [vmem:[#allocation10 + $0x8] sm:$0xff] %v2978_v23 }
 0x3f2   :  { %4084 = shalt.err (!%p4081_p8)
}
 0x3f3   :  { %s4085_s14 = scalar_lea.hbm %s4274_s7, 256 }
 0x3f4   :  { %p4086_p9 = scmp.ne.s32.totalorder %s4274_s7, %s4085_s14  ;;  %p4089_p10 = scmp.lt.u32.totalorder %s4085_s14, %s4274_s7 }
 0x3f6   :  { %p4091_p11 = pnand %p4089_p10, %p4086_p9 }
 0x3f8   :  { %4094 = shalt.err (!%p4091_p11)
}
 0x3f9   :  { %s4115_s16 = smov 128   ;;  %s4116_s19 = smov 8  }
 0x3fa   :  { %2994 = dma.vmem_to_hbm [thread:$0]  %s2989_s9, 256, %s4274_s7, [#allocation4], %s4115_s16, %s4115_s16, %s4116_s19  }
 0x3fb   :  { %4101 = dma.done.wait [#allocation4], 256  }
 0x3fc   :  { %4102 = vsyncadd [#allocation4], 4294967040 }
 0x3fd   :  { %2998 = vsyncpa [#allocation3], 1 }
 0x3fe   :  { %2999 = vsyncpa [#allocation6], 1 }
 0x3ff   :  { %3000 = vsyncpa [#allocation9], 1 }
 0x400   :  { %3001 = vsyncpa [#allocation4], 1 }

</bundles_post_ra>
